<compile_context>
chip_gen: v7x
topology: tpu7x:2x2x1
jax: 0.10.0
libtpu: 0.0.40
codegen_flags: <defaults>
</compile_context>

<pallas_src>
import numpy as np
import jax
import jax.numpy as jnp
from jax.experimental import pallas as pl
from jax.experimental.pallas import tpu as pltpu


# ----------------------------------------------------------------------------
# Autoregressive ('B'-type) mask construction (identical to the PyTorch code).
# ----------------------------------------------------------------------------
def _make_mask(mask_type, in_channels, out_channels, kernel_size, data_channels=3):
    mask = np.zeros((out_channels, in_channels, kernel_size, kernel_size), np.float32)
    kH = kW = kernel_size
    mask[:, :, :kH // 2, :] = 1
    mask[:, :, kH // 2, :kW // 2 + 1] = 1

    def color_mask(color_out, color_in):
        a = (np.arange(out_channels) % data_channels == color_out)[:, None]
        b = (np.arange(in_channels) % data_channels == color_in)[None, :]
        return a * b

    for oc in range(data_channels):
        for ic in range(oc + 1, data_channels):
            mask[color_mask(oc, ic), kH // 2, kW // 2] = 0
    if mask_type == 'A':
        for c in range(data_channels):
            mask[color_mask(c, c), kH // 2, kW // 2] = 0
    return mask


def _allowed_taps(kernel_size):
    """Taps the 'B' spatial mask can keep non-zero (rows < P, row P up to center)."""
    P = kernel_size // 2
    return [(kh, kw) for kh in range(kernel_size) for kw in range(kernel_size)
            if kh < P or (kh == P and kw <= P)]


def _tap_masks(H, W, K, taps, cmid_p):
    """Per-tap spatial validity mask, pre-broadcast to the padded channel tile."""
    P = K // 2
    HW = H * W
    rows = np.arange(HW, dtype=np.int64) // W
    cols = np.arange(HW, dtype=np.int64) % W
    m = np.zeros((len(taps), cmid_p, HW), np.float32)
    for t, (kh, kw) in enumerate(taps):
        dh, dw = kh - P, kw - P           # dh <= 0 for every allowed tap
        valid = (rows + dh >= 0) & (cols + dw >= 0) & (cols + dw < W)
        m[t, :, :] = valid.astype(np.float32)[None, :]
    return m.reshape(len(taps) * cmid_p, HW)


# ----------------------------------------------------------------------------
# Weight packing: masked OIHW conv weights -> matmul layouts used by the kernel.
# ----------------------------------------------------------------------------
def pack_params(w1m, b1, w2m, b2, w3m, b3):
    cmid, cin = int(w1m.shape[0]), int(w1m.shape[1])
    K = int(w2m.shape[-1])
    taps = _allowed_taps(K)
    T = len(taps)
    cmid_p = ((cmid + 7) // 8) * 8        # pad mid channels to a sublane tile

    w1p = jnp.zeros((cmid_p, cin), jnp.float32).at[:cmid].set(w1m[:, :, 0, 0])
    b1p = jnp.zeros((cmid_p, 1), jnp.float32).at[:cmid, 0].set(b1)

    # (Cout, T, Cin) -> (CoutP, T*CinP): column t*CmP + ci holds w2[o, ci, kh_t, kw_t]
    w2sel = jnp.stack([w2m[:, :, kh, kw] for kh, kw in taps], axis=1)
    w2p = (jnp.zeros((cmid_p, T, cmid_p), jnp.float32)
           .at[:cmid, :, :cmid].set(w2sel)
           .reshape(cmid_p, T * cmid_p))
    b2p = jnp.zeros((cmid_p, 1), jnp.float32).at[:cmid, 0].set(b2)

    w3p = jnp.zeros((cin, cmid_p), jnp.float32).at[:, :cmid].set(w3m[:, :, 0, 0])
    b3p = b3.reshape(cin, 1).astype(jnp.float32)

    return (w1p, b1p, w2p, b2p, w3p, b3p), taps, K, cmid_p


# ----------------------------------------------------------------------------
# Pallas kernel: a block of batch images per grid step, everything in VMEM.
# ----------------------------------------------------------------------------
def _make_kernel(H, W, K, taps, b_blk, cmid_p):
    HW = H * W
    P = K // 2
    PADL = P * W + P                                   # largest left shift (= 51 for K=7)
    # Static per-tap lane offsets into the left-padded image; all in [0, PADL].
    offs = [(PADL + (kh - P) * W + (kw - P), (kh == P and kw == P))
            for kh, kw in taps]

    def kernel(x_ref, mask_ref, w1_ref, b1_ref, w2_ref, b2_ref, w3_ref, b3_ref,
               o_ref, patch_ref):
        # Small operands hoisted out of the batch loop.
        w1 = w1_ref[...]
        b1 = b1_ref[...]
        w3 = w3_ref[...]
        b3 = b3_ref[...]
        zpad = jnp.zeros((cmid_p, PADL), jnp.float32)

        for b in range(b_blk):                         # static unroll over the batch block
            x = x_ref[b].astype(jnp.float32)           # (C, HW): channels on sublanes,
                                                       #          H*W dense on lanes
            # conv1 (masked 1x1) -> ReLU : one (CmP, C) @ (C, HW) matmul.
            h1 = jnp.maximum(
                jnp.dot(w1, x, preferred_element_type=jnp.float32) + b1, 0.0)

            # conv2 (masked 7x7, padding=3) as ONE fused matmul.
            # Left-pad h1 along lanes so every allowed tap is a static lane
            # slice; apply the precomputed boundary-validity mask and store the
            # (CmP, HW) piece at an 8-aligned sublane offset of the patch scratch.
            h1e = jnp.concatenate([zpad, h1], axis=1)  # (CmP, PADL + HW)
            for t, (off, is_center) in enumerate(offs):
                rows = pl.ds(t * cmid_p, cmid_p)
                piece = h1e[:, off:off + HW]
                if is_center:                          # center tap: all positions valid
                    patch_ref[rows, :] = piece
                else:
                    patch_ref[rows, :] = piece * mask_ref[rows, :]

            h2 = jnp.maximum(
                jnp.dot(w2_ref[...], patch_ref[...],
                        preferred_element_type=jnp.float32) + b2_ref[...], 0.0)

            # conv3 (masked 1x1) -> ReLU, then residual add; lane-dense store.
            h3 = jnp.maximum(
                jnp.dot(w3, h2, preferred_element_type=jnp.float32) + b3, 0.0)
            o_ref[b] = (h3 + x).astype(o_ref.dtype)

    return kernel


# ----------------------------------------------------------------------------
# Wrapper: NCHW in / NCHW out (only free reshapes, no HBM transposes).
# ----------------------------------------------------------------------------
def residual_masked_conv2d(x_nchw, packed, max_batch_block=8):
    (w1p, b1p, w2p, b2p, w3p, b3p), taps, K, cmid_p = packed
    N, C, H, W = x_nchw.shape
    HW = H * W
    T = len(taps)

    # Largest divisor of N not exceeding max_batch_block (amortize per-step overhead).
    b_blk = max(d for d in range(1, min(max_batch_block, N) + 1) if N % d == 0)

    x = x_nchw.reshape(N, C, HW)                       # free: merges trailing dims
    tap_mask = jnp.asarray(_tap_masks(H, W, K, taps, cmid_p))

    def _const_spec(shape):
        zeros = (0,) * len(shape)
        return pl.BlockSpec(shape, lambda n: zeros)

    out = pl.pallas_call(
        _make_kernel(H, W, K, taps, b_blk, cmid_p),
        out_shape=jax.ShapeDtypeStruct((N, C, HW), x.dtype),
        grid=(N // b_blk,),
        in_specs=[pl.BlockSpec((b_blk, C, HW), lambda n: (n, 0, 0)),
                  _const_spec(tap_mask.shape),
                  _const_spec(w1p.shape), _const_spec(b1p.shape),
                  _const_spec(w2p.shape), _const_spec(b2p.shape),
                  _const_spec(w3p.shape), _const_spec(b3p.shape)],
        out_specs=pl.BlockSpec((b_blk, C, HW), lambda n: (n, 0, 0)),
        scratch_shapes=[pltpu.VMEM((T * cmid_p, HW), jnp.float32)],
        compiler_params=pltpu.CompilerParams(
            dimension_semantics=("parallel",)),        # batch is independent -> megacore
    )(x, tap_mask, w1p, b1p, w2p, b2p, w3p, b3p)

    return out.reshape(N, C, H, W)


# ----------------------------------------------------------------------------
# Pure-JAX reference (NCHW / OIHW), used to verify the kernel.
# ----------------------------------------------------------------------------
def _conv2d_nchw(x, w_oihw, b, padding):
    out = jax.lax.conv_general_dilated(
        x, w_oihw, window_strides=(1, 1),
        padding=((padding, padding), (padding, padding)),
        dimension_numbers=('NCHW', 'OIHW', 'NCHW'),
        precision=jax.lax.Precision.HIGHEST)
    return out + b[None, :, None, None]


def _reference(x, masked_params):
    (w1, b1), (w2, b2), (w3, b3) = masked_params
    h = jax.nn.relu(_conv2d_nchw(x, w1, b1, 0))
    h = jax.nn.relu(_conv2d_nchw(h, w2, b2, 3))
    h = jax.nn.relu(_conv2d_nchw(h, w3, b3, 0))
    return h + x


# ----------------------------------------------------------------------------
if __name__ == "__main__":
    key = jax.random.PRNGKey(0)
    in_dim = 6              # divisible by data_channels=3 and by 2
    mid = in_dim // 2
    N, H, W = 2, 16, 16

    keys = jax.random.split(key, 4)
    x = jax.random.normal(keys[0], (N, in_dim, H, W), jnp.float32)

    def init_conv(k, out_c, in_c, ks):
        kw_, kb_ = jax.random.split(k)
        bound = 1.0 / np.sqrt(in_c * ks * ks)
        w = jax.random.uniform(kw_, (out_c, in_c, ks, ks), jnp.float32, -bound, bound)
        b = jax.random.uniform(kb_, (out_c,), jnp.float32, -bound, bound)
        return w, b

    w1_oihw, b1 = init_conv(keys[1], mid, in_dim, 1)
    w2_oihw, b2 = init_conv(keys[2], mid, mid, 7)
    w3_oihw, b3 = init_conv(keys[3], in_dim, mid, 1)

    # Apply autoregressive 'B' masks (idempotent, matches the PyTorch forward,
    # which does `self.weight.data *= self.mask` before every conv).
    w1m = w1_oihw * jnp.asarray(_make_mask('B', in_dim, mid, 1))
    w2m = w2_oihw * jnp.asarray(_make_mask('B', mid, mid, 7))
    w3m = w3_oihw * jnp.asarray(_make_mask('B', mid, in_dim, 1))

    packed = pack_params(w1m, b1, w2m, b2, w3m, b3)

    out = residual_masked_conv2d(x, packed)
    out = jax.block_until_ready(out)

    ref = _reference(x, ((w1m, b1), (w2m, b2), (w3m, b3)))
    np.testing.assert_allclose(np.asarray(out), np.asarray(ref), atol=2e-2, rtol=2e-2)

    print("KERNEL_OK")
</pallas_src>

<mosaic_0001>
module attributes {stable_mosaic.version = 11 : i64} {
  func.func @kernel(%arg0: i32, %arg1: memref<2x6x256xf32, #tpu.memory_space<vmem>>, %arg2: memref<200x256xf32, #tpu.memory_space<vmem>>, %arg3: memref<8x6xf32, #tpu.memory_space<vmem>>, %arg4: memref<8x1xf32, #tpu.memory_space<vmem>>, %arg5: memref<8x200xf32, #tpu.memory_space<vmem>>, %arg6: memref<8x1xf32, #tpu.memory_space<vmem>>, %arg7: memref<6x8xf32, #tpu.memory_space<vmem>>, %arg8: memref<6x1xf32, #tpu.memory_space<vmem>>, %arg9: memref<2x6x256xf32, #tpu.memory_space<vmem>>, %arg10: memref<200x256xf32, #tpu.memory_space<vmem>>) attributes {dimension_semantics = [#tpu.dimension_semantics<parallel>], iteration_bounds = array<i64: 1>, scalar_prefetch = 0 : i64, scratch_operands = 1 : i64, tpu.core_type = #tpu.core_type<tc>, window_params = [{transform_indices = @transform_0, window_bounds = array<i64: 2, 6, 256>}, {pipeline_mode = #tpu.pipeline_mode<synchronous>, transform_indices = @transform_1, window_bounds = array<i64: 200, 256>}, {pipeline_mode = #tpu.pipeline_mode<synchronous>, transform_indices = @transform_2, window_bounds = array<i64: 8, 6>}, {pipeline_mode = #tpu.pipeline_mode<synchronous>, transform_indices = @transform_3, window_bounds = array<i64: 8, 1>}, {pipeline_mode = #tpu.pipeline_mode<synchronous>, transform_indices = @transform_4, window_bounds = array<i64: 8, 200>}, {pipeline_mode = #tpu.pipeline_mode<synchronous>, transform_indices = @transform_5, window_bounds = array<i64: 8, 1>}, {pipeline_mode = #tpu.pipeline_mode<synchronous>, transform_indices = @transform_6, window_bounds = array<i64: 6, 8>}, {pipeline_mode = #tpu.pipeline_mode<synchronous>, transform_indices = @transform_7, window_bounds = array<i64: 6, 1>}, {transform_indices = @transform_8, window_bounds = array<i64: 2, 6, 256>}]} {
    %c0 = arith.constant 0 : index
    %c0_0 = arith.constant 0 : index
    %0 = vector.load %arg3[%c0, %c0_0] : memref<8x6xf32, #tpu.memory_space<vmem>>, vector<8x6xf32>
    %c0_1 = arith.constant 0 : index
    %c0_2 = arith.constant 0 : index
    %1 = vector.load %arg4[%c0_1, %c0_2] : memref<8x1xf32, #tpu.memory_space<vmem>>, vector<8x1xf32>
    %c0_3 = arith.constant 0 : index
    %c0_4 = arith.constant 0 : index
    %2 = vector.load %arg7[%c0_3, %c0_4] : memref<6x8xf32, #tpu.memory_space<vmem>>, vector<6x8xf32>
    %c0_5 = arith.constant 0 : index
    %c0_6 = arith.constant 0 : index
    %3 = vector.load %arg8[%c0_5, %c0_6] : memref<6x1xf32, #tpu.memory_space<vmem>>, vector<6x1xf32>
    %cst = arith.constant 0.000000e+00 : f32
    %4 = vector.broadcast %cst : f32 to vector<8x51xf32>
    %c0_7 = arith.constant 0 : index
    %c0_8 = arith.constant 0 : index
    %c0_9 = arith.constant 0 : index
    %5 = vector.load %arg1[%c0_7, %c0_8, %c0_9] : memref<2x6x256xf32, #tpu.memory_space<vmem>>, vector<1x6x256xf32>
    %6 = vector.shape_cast %5 : vector<1x6x256xf32> to vector<6x256xf32>
    %cst_10 = arith.constant dense<0.000000e+00> : vector<8x256xf32>
    %7 = tpu.matmul %0, %6, %cst_10 {dimension_numbers = #tpu.dot_dimension_numbers<[1], [0], [0], [1], [0, 0, 1, 1], [], []>} : vector<8x6xf32>, vector<6x256xf32>, vector<8x256xf32> -> vector<8x256xf32>
    %8 = vector.broadcast %1 : vector<8x1xf32> to vector<8x256xf32>
    %9 = arith.addf %7, %8 : vector<8x256xf32>
    %cst_11 = arith.constant 0.000000e+00 : f32
    %10 = vector.broadcast %cst_11 : f32 to vector<8x256xf32>
    %11 = arith.maximumf %9, %10 : vector<8x256xf32>
    %12 = tpu.concatenate %4, %11 in 1 : vector<8x51xf32>, vector<8x256xf32> -> vector<8x307xf32>
    %13 = vector.extract_strided_slice %12 {offsets = [0, 0], sizes = [8, 256], strides = [1, 1]} : vector<8x307xf32> to vector<8x256xf32>
    %c0_12 = arith.constant 0 : index
    %c0_13 = arith.constant 0 : index
    %14 = vector.load %arg2[%c0_12, %c0_13] : memref<200x256xf32, #tpu.memory_space<vmem>>, vector<8x256xf32>
    %15 = arith.mulf %13, %14 : vector<8x256xf32>
    %c0_14 = arith.constant 0 : index
    %c0_15 = arith.constant 0 : index
    %16 = vector.load %arg10[%c0_14, %c0_15] : memref<200x256xf32, #tpu.memory_space<vmem>>, vector<8x256xf32>
    tpu.vector_store %arg10[%c0_14, %c0_15], %15 {strides = array<i32>} : memref<200x256xf32, #tpu.memory_space<vmem>>, vector<8x256xf32>,
    %17 = vector.extract_strided_slice %12 {offsets = [0, 1], sizes = [8, 256], strides = [1, 1]} : vector<8x307xf32> to vector<8x256xf32>
    %c8 = arith.constant 8 : index
    %c0_16 = arith.constant 0 : index
    %18 = vector.load %arg2[%c8, %c0_16] : memref<200x256xf32, #tpu.memory_space<vmem>>, vector<8x256xf32>
    %19 = arith.mulf %17, %18 : vector<8x256xf32>
    %c8_17 = arith.constant 8 : index
    %c0_18 = arith.constant 0 : index
    %20 = vector.load %arg10[%c8_17, %c0_18] : memref<200x256xf32, #tpu.memory_space<vmem>>, vector<8x256xf32>
    tpu.vector_store %arg10[%c8_17, %c0_18], %19 {strides = array<i32>} : memref<200x256xf32, #tpu.memory_space<vmem>>, vector<8x256xf32>,
    %21 = vector.extract_strided_slice %12 {offsets = [0, 2], sizes = [8, 256], strides = [1, 1]} : vector<8x307xf32> to vector<8x256xf32>
    %c16 = arith.constant 16 : index
    %c0_19 = arith.constant 0 : index
    %22 = vector.load %arg2[%c16, %c0_19] : memref<200x256xf32, #tpu.memory_space<vmem>>, vector<8x256xf32>
    %23 = arith.mulf %21, %22 : vector<8x256xf32>
    %c16_20 = arith.constant 16 : index
    %c0_21 = arith.constant 0 : index
    %24 = vector.load %arg10[%c16_20, %c0_21] : memref<200x256xf32, #tpu.memory_space<vmem>>, vector<8x256xf32>
    tpu.vector_store %arg10[%c16_20, %c0_21], %23 {strides = array<i32>} : memref<200x256xf32, #tpu.memory_space<vmem>>, vector<8x256xf32>,
    %25 = vector.extract_strided_slice %12 {offsets = [0, 3], sizes = [8, 256], strides = [1, 1]} : vector<8x307xf32> to vector<8x256xf32>
    %c24 = arith.constant 24 : index
    %c0_22 = arith.constant 0 : index
    %26 = vector.load %arg2[%c24, %c0_22] : memref<200x256xf32, #tpu.memory_space<vmem>>, vector<8x256xf32>
    %27 = arith.mulf %25, %26 : vector<8x256xf32>
    %c24_23 = arith.constant 24 : index
    %c0_24 = arith.constant 0 : index
    %28 = vector.load %arg10[%c24_23, %c0_24] : memref<200x256xf32, #tpu.memory_space<vmem>>, vector<8x256xf32>
    tpu.vector_store %arg10[%c24_23, %c0_24], %27 {strides = array<i32>} : memref<200x256xf32, #tpu.memory_space<vmem>>, vector<8x256xf32>,
    %29 = vector.extract_strided_slice %12 {offsets = [0, 4], sizes = [8, 256], strides = [1, 1]} : vector<8x307xf32> to vector<8x256xf32>
    %c32 = arith.constant 32 : index
    %c0_25 = arith.constant 0 : index
    %30 = vector.load %arg2[%c32, %c0_25] : memref<200x256xf32, #tpu.memory_space<vmem>>, vector<8x256xf32>
    %31 = arith.mulf %29, %30 : vector<8x256xf32>
    %c32_26 = arith.constant 32 : index
    %c0_27 = arith.constant 0 : index
    %32 = vector.load %arg10[%c32_26, %c0_27] : memref<200x256xf32, #tpu.memory_space<vmem>>, vector<8x256xf32>
    tpu.vector_store %arg10[%c32_26, %c0_27], %31 {strides = array<i32>} : memref<200x256xf32, #tpu.memory_space<vmem>>, vector<8x256xf32>,
    %33 = vector.extract_strided_slice %12 {offsets = [0, 5], sizes = [8, 256], strides = [1, 1]} : vector<8x307xf32> to vector<8x256xf32>
    %c40 = arith.constant 40 : index
    %c0_28 = arith.constant 0 : index
    %34 = vector.load %arg2[%c40, %c0_28] : memref<200x256xf32, #tpu.memory_space<vmem>>, vector<8x256xf32>
    %35 = arith.mulf %33, %34 : vector<8x256xf32>
    %c40_29 = arith.constant 40 : index
    %c0_30 = arith.constant 0 : index
    %36 = vector.load %arg10[%c40_29, %c0_30] : memref<200x256xf32, #tpu.memory_space<vmem>>, vector<8x256xf32>
    tpu.vector_store %arg10[%c40_29, %c0_30], %35 {strides = array<i32>} : memref<200x256xf32, #tpu.memory_space<vmem>>, vector<8x256xf32>,
    %37 = vector.extract_strided_slice %12 {offsets = [0, 6], sizes = [8, 256], strides = [1, 1]} : vector<8x307xf32> to vector<8x256xf32>
    %c48 = arith.constant 48 : index
    %c0_31 = arith.constant 0 : index
    %38 = vector.load %arg2[%c48, %c0_31] : memref<200x256xf32, #tpu.memory_space<vmem>>, vector<8x256xf32>
    %39 = arith.mulf %37, %38 : vector<8x256xf32>
    %c48_32 = arith.constant 48 : index
    %c0_33 = arith.constant 0 : index
    %40 = vector.load %arg10[%c48_32, %c0_33] : memref<200x256xf32, #tpu.memory_space<vmem>>, vector<8x256xf32>
    tpu.vector_store %arg10[%c48_32, %c0_33], %39 {strides = array<i32>} : memref<200x256xf32, #tpu.memory_space<vmem>>, vector<8x256xf32>,
    %41 = vector.extract_strided_slice %12 {offsets = [0, 16], sizes = [8, 256], strides = [1, 1]} : vector<8x307xf32> to vector<8x256xf32>
    %c56 = arith.constant 56 : index
    %c0_34 = arith.constant 0 : index
    %42 = vector.load %arg2[%c56, %c0_34] : memref<200x256xf32, #tpu.memory_space<vmem>>, vector<8x256xf32>
    %43 = arith.mulf %41, %42 : vector<8x256xf32>
    %c56_35 = arith.constant 56 : index
    %c0_36 = arith.constant 0 : index
    %44 = vector.load %arg10[%c56_35, %c0_36] : memref<200x256xf32, #tpu.memory_space<vmem>>, vector<8x256xf32>
    tpu.vector_store %arg10[%c56_35, %c0_36], %43 {strides = array<i32>} : memref<200x256xf32, #tpu.memory_space<vmem>>, vector<8x256xf32>,
    %45 = vector.extract_strided_slice %12 {offsets = [0, 17], sizes = [8, 256], strides = [1, 1]} : vector<8x307xf32> to vector<8x256xf32>
    %c64 = arith.constant 64 : index
    %c0_37 = arith.constant 0 : index
    %46 = vector.load %arg2[%c64, %c0_37] : memref<200x256xf32, #tpu.memory_space<vmem>>, vector<8x256xf32>
    %47 = arith.mulf %45, %46 : vector<8x256xf32>
    %c64_38 = arith.constant 64 : index
    %c0_39 = arith.constant 0 : index
    %48 = vector.load %arg10[%c64_38, %c0_39] : memref<200x256xf32, #tpu.memory_space<vmem>>, vector<8x256xf32>
    tpu.vector_store %arg10[%c64_38, %c0_39], %47 {strides = array<i32>} : memref<200x256xf32, #tpu.memory_space<vmem>>, vector<8x256xf32>,
    %49 = vector.extract_strided_slice %12 {offsets = [0, 18], sizes = [8, 256], strides = [1, 1]} : vector<8x307xf32> to vector<8x256xf32>
    %c72 = arith.constant 72 : index
    %c0_40 = arith.constant 0 : index
    %50 = vector.load %arg2[%c72, %c0_40] : memref<200x256xf32, #tpu.memory_space<vmem>>, vector<8x256xf32>
    %51 = arith.mulf %49, %50 : vector<8x256xf32>
    %c72_41 = arith.constant 72 : index
    %c0_42 = arith.constant 0 : index
    %52 = vector.load %arg10[%c72_41, %c0_42] : memref<200x256xf32, #tpu.memory_space<vmem>>, vector<8x256xf32>
    tpu.vector_store %arg10[%c72_41, %c0_42], %51 {strides = array<i32>} : memref<200x256xf32, #tpu.memory_space<vmem>>, vector<8x256xf32>,
    %53 = vector.extract_strided_slice %12 {offsets = [0, 19], sizes = [8, 256], strides = [1, 1]} : vector<8x307xf32> to vector<8x256xf32>
    %c80 = arith.constant 80 : index
    %c0_43 = arith.constant 0 : index
    %54 = vector.load %arg2[%c80, %c0_43] : memref<200x256xf32, #tpu.memory_space<vmem>>, vector<8x256xf32>
    %55 = arith.mulf %53, %54 : vector<8x256xf32>
    %c80_44 = arith.constant 80 : index
    %c0_45 = arith.constant 0 : index
    %56 = vector.load %arg10[%c80_44, %c0_45] : memref<200x256xf32, #tpu.memory_space<vmem>>, vector<8x256xf32>
    tpu.vector_store %arg10[%c80_44, %c0_45], %55 {strides = array<i32>} : memref<200x256xf32, #tpu.memory_space<vmem>>, vector<8x256xf32>,
    %57 = vector.extract_strided_slice %12 {offsets = [0, 20], sizes = [8, 256], strides = [1, 1]} : vector<8x307xf32> to vector<8x256xf32>
    %c88 = arith.constant 88 : index
    %c0_46 = arith.constant 0 : index
    %58 = vector.load %arg2[%c88, %c0_46] : memref<200x256xf32, #tpu.memory_space<vmem>>, vector<8x256xf32>
    %59 = arith.mulf %57, %58 : vector<8x256xf32>
    %c88_47 = arith.constant 88 : index
    %c0_48 = arith.constant 0 : index
    %60 = vector.load %arg10[%c88_47, %c0_48] : memref<200x256xf32, #tpu.memory_space<vmem>>, vector<8x256xf32>
    tpu.vector_store %arg10[%c88_47, %c0_48], %59 {strides = array<i32>} : memref<200x256xf32, #tpu.memory_space<vmem>>, vector<8x256xf32>,
    %61 = vector.extract_strided_slice %12 {offsets = [0, 21], sizes = [8, 256], strides = [1, 1]} : vector<8x307xf32> to vector<8x256xf32>
    %c96 = arith.constant 96 : index
    %c0_49 = arith.constant 0 : index
    %62 = vector.load %arg2[%c96, %c0_49] : memref<200x256xf32, #tpu.memory_space<vmem>>, vector<8x256xf32>
    %63 = arith.mulf %61, %62 : vector<8x256xf32>
    %c96_50 = arith.constant 96 : index
    %c0_51 = arith.constant 0 : index
    %64 = vector.load %arg10[%c96_50, %c0_51] : memref<200x256xf32, #tpu.memory_space<vmem>>, vector<8x256xf32>
    tpu.vector_store %arg10[%c96_50, %c0_51], %63 {strides = array<i32>} : memref<200x256xf32, #tpu.memory_space<vmem>>, vector<8x256xf32>,
    %65 = vector.extract_strided_slice %12 {offsets = [0, 22], sizes = [8, 256], strides = [1, 1]} : vector<8x307xf32> to vector<8x256xf32>
    %c104 = arith.constant 104 : index
    %c0_52 = arith.constant 0 : index
    %66 = vector.load %arg2[%c104, %c0_52] : memref<200x256xf32, #tpu.memory_space<vmem>>, vector<8x256xf32>
    %67 = arith.mulf %65, %66 : vector<8x256xf32>
    %c104_53 = arith.constant 104 : index
    %c0_54 = arith.constant 0 : index
    %68 = vector.load %arg10[%c104_53, %c0_54] : memref<200x256xf32, #tpu.memory_space<vmem>>, vector<8x256xf32>
    tpu.vector_store %arg10[%c104_53, %c0_54], %67 {strides = array<i32>} : memref<200x256xf32, #tpu.memory_space<vmem>>, vector<8x256xf32>,
    %69 = vector.extract_strided_slice %12 {offsets = [0, 32], sizes = [8, 256], strides = [1, 1]} : vector<8x307xf32> to vector<8x256xf32>
    %c112 = arith.constant 112 : index
    %c0_55 = arith.constant 0 : index
    %70 = vector.load %arg2[%c112, %c0_55] : memref<200x256xf32, #tpu.memory_space<vmem>>, vector<8x256xf32>
    %71 = arith.mulf %69, %70 : vector<8x256xf32>
    %c112_56 = arith.constant 112 : index
    %c0_57 = arith.constant 0 : index
    %72 = vector.load %arg10[%c112_56, %c0_57] : memref<200x256xf32, #tpu.memory_space<vmem>>, vector<8x256xf32>
    tpu.vector_store %arg10[%c112_56, %c0_57], %71 {strides = array<i32>} : memref<200x256xf32, #tpu.memory_space<vmem>>, vector<8x256xf32>,
    %73 = vector.extract_strided_slice %12 {offsets = [0, 33], sizes = [8, 256], strides = [1, 1]} : vector<8x307xf32> to vector<8x256xf32>
    %c120 = arith.constant 120 : index
    %c0_58 = arith.constant 0 : index
    %74 = vector.load %arg2[%c120, %c0_58] : memref<200x256xf32, #tpu.memory_space<vmem>>, vector<8x256xf32>
    %75 = arith.mulf %73, %74 : vector<8x256xf32>
    %c120_59 = arith.constant 120 : index
    %c0_60 = arith.constant 0 : index
    %76 = vector.load %arg10[%c120_59, %c0_60] : memref<200x256xf32, #tpu.memory_space<vmem>>, vector<8x256xf32>
    tpu.vector_store %arg10[%c120_59, %c0_60], %75 {strides = array<i32>} : memref<200x256xf32, #tpu.memory_space<vmem>>, vector<8x256xf32>,
    %77 = vector.extract_strided_slice %12 {offsets = [0, 34], sizes = [8, 256], strides = [1, 1]} : vector<8x307xf32> to vector<8x256xf32>
    %c128 = arith.constant 128 : index
    %c0_61 = arith.constant 0 : index
    %78 = vector.load %arg2[%c128, %c0_61] : memref<200x256xf32, #tpu.memory_space<vmem>>, vector<8x256xf32>
    %79 = arith.mulf %77, %78 : vector<8x256xf32>
    %c128_62 = arith.constant 128 : index
    %c0_63 = arith.constant 0 : index
    %80 = vector.load %arg10[%c128_62, %c0_63] : memref<200x256xf32, #tpu.memory_space<vmem>>, vector<8x256xf32>
    tpu.vector_store %arg10[%c128_62, %c0_63], %79 {strides = array<i32>} : memref<200x256xf32, #tpu.memory_space<vmem>>, vector<8x256xf32>,
    %81 = vector.extract_strided_slice %12 {offsets = [0, 35], sizes = [8, 256], strides = [1, 1]} : vector<8x307xf32> to vector<8x256xf32>
    %c136 = arith.constant 136 : index
    %c0_64 = arith.constant 0 : index
    %82 = vector.load %arg2[%c136, %c0_64] : memref<200x256xf32, #tpu.memory_space<vmem>>, vector<8x256xf32>
    %83 = arith.mulf %81, %82 : vector<8x256xf32>
    %c136_65 = arith.constant 136 : index
    %c0_66 = arith.constant 0 : index
    %84 = vector.load %arg10[%c136_65, %c0_66] : memref<200x256xf32, #tpu.memory_space<vmem>>, vector<8x256xf32>
    tpu.vector_store %arg10[%c136_65, %c0_66], %83 {strides = array<i32>} : memref<200x256xf32, #tpu.memory_space<vmem>>, vector<8x256xf32>,
    %85 = vector.extract_strided_slice %12 {offsets = [0, 36], sizes = [8, 256], strides = [1, 1]} : vector<8x307xf32> to vector<8x256xf32>
    %c144 = arith.constant 144 : index
    %c0_67 = arith.constant 0 : index
    %86 = vector.load %arg2[%c144, %c0_67] : memref<200x256xf32, #tpu.memory_space<vmem>>, vector<8x256xf32>
    %87 = arith.mulf %85, %86 : vector<8x256xf32>
    %c144_68 = arith.constant 144 : index
    %c0_69 = arith.constant 0 : index
    %88 = vector.load %arg10[%c144_68, %c0_69] : memref<200x256xf32, #tpu.memory_space<vmem>>, vector<8x256xf32>
    tpu.vector_store %arg10[%c144_68, %c0_69], %87 {strides = array<i32>} : memref<200x256xf32, #tpu.memory_space<vmem>>, vector<8x256xf32>,
    %89 = vector.extract_strided_slice %12 {offsets = [0, 37], sizes = [8, 256], strides = [1, 1]} : vector<8x307xf32> to vector<8x256xf32>
    %c152 = arith.constant 152 : index
    %c0_70 = arith.constant 0 : index
    %90 = vector.load %arg2[%c152, %c0_70] : memref<200x256xf32, #tpu.memory_space<vmem>>, vector<8x256xf32>
    %91 = arith.mulf %89, %90 : vector<8x256xf32>
    %c152_71 = arith.constant 152 : index
    %c0_72 = arith.constant 0 : index
    %92 = vector.load %arg10[%c152_71, %c0_72] : memref<200x256xf32, #tpu.memory_space<vmem>>, vector<8x256xf32>
    tpu.vector_store %arg10[%c152_71, %c0_72], %91 {strides = array<i32>} : memref<200x256xf32, #tpu.memory_space<vmem>>, vector<8x256xf32>,
    %93 = vector.extract_strided_slice %12 {offsets = [0, 38], sizes = [8, 256], strides = [1, 1]} : vector<8x307xf32> to vector<8x256xf32>
    %c160 = arith.constant 160 : index
    %c0_73 = arith.constant 0 : index
    %94 = vector.load %arg2[%c160, %c0_73] : memref<200x256xf32, #tpu.memory_space<vmem>>, vector<8x256xf32>
    %95 = arith.mulf %93, %94 : vector<8x256xf32>
    %c160_74 = arith.constant 160 : index
    %c0_75 = arith.constant 0 : index
    %96 = vector.load %arg10[%c160_74, %c0_75] : memref<200x256xf32, #tpu.memory_space<vmem>>, vector<8x256xf32>
    tpu.vector_store %arg10[%c160_74, %c0_75], %95 {strides = array<i32>} : memref<200x256xf32, #tpu.memory_space<vmem>>, vector<8x256xf32>,
    %97 = vector.extract_strided_slice %12 {offsets = [0, 48], sizes = [8, 256], strides = [1, 1]} : vector<8x307xf32> to vector<8x256xf32>
    %c168 = arith.constant 168 : index
    %c0_76 = arith.constant 0 : index
    %98 = vector.load %arg2[%c168, %c0_76] : memref<200x256xf32, #tpu.memory_space<vmem>>, vector<8x256xf32>
    %99 = arith.mulf %97, %98 : vector<8x256xf32>
    %c168_77 = arith.constant 168 : index
    %c0_78 = arith.constant 0 : index
    %100 = vector.load %arg10[%c168_77, %c0_78] : memref<200x256xf32, #tpu.memory_space<vmem>>, vector<8x256xf32>
    tpu.vector_store %arg10[%c168_77, %c0_78], %99 {strides = array<i32>} : memref<200x256xf32, #tpu.memory_space<vmem>>, vector<8x256xf32>,
    %101 = vector.extract_strided_slice %12 {offsets = [0, 49], sizes = [8, 256], strides = [1, 1]} : vector<8x307xf32> to vector<8x256xf32>
    %c176 = arith.constant 176 : index
    %c0_79 = arith.constant 0 : index
    %102 = vector.load %arg2[%c176, %c0_79] : memref<200x256xf32, #tpu.memory_space<vmem>>, vector<8x256xf32>
    %103 = arith.mulf %101, %102 : vector<8x256xf32>
    %c176_80 = arith.constant 176 : index
    %c0_81 = arith.constant 0 : index
    %104 = vector.load %arg10[%c176_80, %c0_81] : memref<200x256xf32, #tpu.memory_space<vmem>>, vector<8x256xf32>
    tpu.vector_store %arg10[%c176_80, %c0_81], %103 {strides = array<i32>} : memref<200x256xf32, #tpu.memory_space<vmem>>, vector<8x256xf32>,
    %105 = vector.extract_strided_slice %12 {offsets = [0, 50], sizes = [8, 256], strides = [1, 1]} : vector<8x307xf32> to vector<8x256xf32>
    %c184 = arith.constant 184 : index
    %c0_82 = arith.constant 0 : index
    %106 = vector.load %arg2[%c184, %c0_82] : memref<200x256xf32, #tpu.memory_space<vmem>>, vector<8x256xf32>
    %107 = arith.mulf %105, %106 : vector<8x256xf32>
    %c184_83 = arith.constant 184 : index
    %c0_84 = arith.constant 0 : index
    %108 = vector.load %arg10[%c184_83, %c0_84] : memref<200x256xf32, #tpu.memory_space<vmem>>, vector<8x256xf32>
    tpu.vector_store %arg10[%c184_83, %c0_84], %107 {strides = array<i32>} : memref<200x256xf32, #tpu.memory_space<vmem>>, vector<8x256xf32>,
    %109 = vector.extract_strided_slice %12 {offsets = [0, 51], sizes = [8, 256], strides = [1, 1]} : vector<8x307xf32> to vector<8x256xf32>
    %c192 = arith.constant 192 : index
    %c0_85 = arith.constant 0 : index
    %110 = vector.load %arg10[%c192, %c0_85] : memref<200x256xf32, #tpu.memory_space<vmem>>, vector<8x256xf32>
    tpu.vector_store %arg10[%c192, %c0_85], %109 {strides = array<i32>} : memref<200x256xf32, #tpu.memory_space<vmem>>, vector<8x256xf32>,
    %c0_86 = arith.constant 0 : index
    %c0_87 = arith.constant 0 : index
    %111 = vector.load %arg5[%c0_86, %c0_87] : memref<8x200xf32, #tpu.memory_space<vmem>>, vector<8x200xf32>
    %c0_88 = arith.constant 0 : index
    %c0_89 = arith.constant 0 : index
    %112 = vector.load %arg10[%c0_88, %c0_89] : memref<200x256xf32, #tpu.memory_space<vmem>>, vector<200x256xf32>
    %cst_90 = arith.constant dense<0.000000e+00> : vector<8x256xf32>
    %113 = tpu.matmul %111, %112, %cst_90 {dimension_numbers = #tpu.dot_dimension_numbers<[1], [0], [0], [1], [0, 0, 1, 1], [], []>} : vector<8x200xf32>, vector<200x256xf32>, vector<8x256xf32> -> vector<8x256xf32>
    %c0_91 = arith.constant 0 : index
    %c0_92 = arith.constant 0 : index
    %114 = vector.load %arg6[%c0_91, %c0_92] : memref<8x1xf32, #tpu.memory_space<vmem>>, vector<8x1xf32>
    %115 = vector.broadcast %114 : vector<8x1xf32> to vector<8x256xf32>
    %116 = arith.addf %113, %115 : vector<8x256xf32>
    %cst_93 = arith.constant 0.000000e+00 : f32
    %117 = vector.broadcast %cst_93 : f32 to vector<8x256xf32>
    %118 = arith.maximumf %116, %117 : vector<8x256xf32>
    %cst_94 = arith.constant dense<0.000000e+00> : vector<6x256xf32>
    %119 = tpu.matmul %2, %118, %cst_94 {dimension_numbers = #tpu.dot_dimension_numbers<[1], [0], [0], [1], [0, 0, 1, 1], [], []>} : vector<6x8xf32>, vector<8x256xf32>, vector<6x256xf32> -> vector<6x256xf32>
    %120 = vector.broadcast %3 : vector<6x1xf32> to vector<6x256xf32>
    %121 = arith.addf %119, %120 : vector<6x256xf32>
    %cst_95 = arith.constant 0.000000e+00 : f32
    %122 = vector.broadcast %cst_95 : f32 to vector<6x256xf32>
    %123 = arith.maximumf %121, %122 : vector<6x256xf32>
    %124 = arith.addf %123, %6 : vector<6x256xf32>
    %c0_96 = arith.constant 0 : index
    %c0_97 = arith.constant 0 : index
    %c0_98 = arith.constant 0 : index
    %125 = vector.load %arg9[%c0_96, %c0_97, %c0_98] : memref<2x6x256xf32, #tpu.memory_space<vmem>>, vector<1x6x256xf32>
    %126 = vector.shape_cast %125 : vector<1x6x256xf32> to vector<6x256xf32>
    %127 = vector.shape_cast %124 : vector<6x256xf32> to vector<1x6x256xf32>
    tpu.vector_store %arg9[%c0_96, %c0_97, %c0_98], %127 {strides = array<i32>} : memref<2x6x256xf32, #tpu.memory_space<vmem>>, vector<1x6x256xf32>,
    %c1 = arith.constant 1 : index
    %c0_99 = arith.constant 0 : index
    %c0_100 = arith.constant 0 : index
    %128 = vector.load %arg1[%c1, %c0_99, %c0_100] : memref<2x6x256xf32, #tpu.memory_space<vmem>>, vector<1x6x256xf32>
    %129 = vector.shape_cast %128 : vector<1x6x256xf32> to vector<6x256xf32>
    %cst_101 = arith.constant dense<0.000000e+00> : vector<8x256xf32>
    %130 = tpu.matmul %0, %129, %cst_101 {dimension_numbers = #tpu.dot_dimension_numbers<[1], [0], [0], [1], [0, 0, 1, 1], [], []>} : vector<8x6xf32>, vector<6x256xf32>, vector<8x256xf32> -> vector<8x256xf32>
    %131 = vector.broadcast %1 : vector<8x1xf32> to vector<8x256xf32>
    %132 = arith.addf %130, %131 : vector<8x256xf32>
    %cst_102 = arith.constant 0.000000e+00 : f32
    %133 = vector.broadcast %cst_102 : f32 to vector<8x256xf32>
    %134 = arith.maximumf %132, %133 : vector<8x256xf32>
    %135 = tpu.concatenate %4, %134 in 1 : vector<8x51xf32>, vector<8x256xf32> -> vector<8x307xf32>
    %136 = vector.extract_strided_slice %135 {offsets = [0, 0], sizes = [8, 256], strides = [1, 1]} : vector<8x307xf32> to vector<8x256xf32>
    %c0_103 = arith.constant 0 : index
    %c0_104 = arith.constant 0 : index
    %137 = vector.load %arg2[%c0_103, %c0_104] : memref<200x256xf32, #tpu.memory_space<vmem>>, vector<8x256xf32>
    %138 = arith.mulf %136, %137 : vector<8x256xf32>
    %c0_105 = arith.constant 0 : index
    %c0_106 = arith.constant 0 : index
    %139 = vector.load %arg10[%c0_105, %c0_106] : memref<200x256xf32, #tpu.memory_space<vmem>>, vector<8x256xf32>
    tpu.vector_store %arg10[%c0_105, %c0_106], %138 {strides = array<i32>} : memref<200x256xf32, #tpu.memory_space<vmem>>, vector<8x256xf32>,
    %140 = vector.extract_strided_slice %135 {offsets = [0, 1], sizes = [8, 256], strides = [1, 1]} : vector<8x307xf32> to vector<8x256xf32>
    %c8_107 = arith.constant 8 : index
    %c0_108 = arith.constant 0 : index
    %141 = vector.load %arg2[%c8_107, %c0_108] : memref<200x256xf32, #tpu.memory_space<vmem>>, vector<8x256xf32>
    %142 = arith.mulf %140, %141 : vector<8x256xf32>
    %c8_109 = arith.constant 8 : index
    %c0_110 = arith.constant 0 : index
    %143 = vector.load %arg10[%c8_109, %c0_110] : memref<200x256xf32, #tpu.memory_space<vmem>>, vector<8x256xf32>
    tpu.vector_store %arg10[%c8_109, %c0_110], %142 {strides = array<i32>} : memref<200x256xf32, #tpu.memory_space<vmem>>, vector<8x256xf32>,
    %144 = vector.extract_strided_slice %135 {offsets = [0, 2], sizes = [8, 256], strides = [1, 1]} : vector<8x307xf32> to vector<8x256xf32>
    %c16_111 = arith.constant 16 : index
    %c0_112 = arith.constant 0 : index
    %145 = vector.load %arg2[%c16_111, %c0_112] : memref<200x256xf32, #tpu.memory_space<vmem>>, vector<8x256xf32>
    %146 = arith.mulf %144, %145 : vector<8x256xf32>
    %c16_113 = arith.constant 16 : index
    %c0_114 = arith.constant 0 : index
    %147 = vector.load %arg10[%c16_113, %c0_114] : memref<200x256xf32, #tpu.memory_space<vmem>>, vector<8x256xf32>
    tpu.vector_store %arg10[%c16_113, %c0_114], %146 {strides = array<i32>} : memref<200x256xf32, #tpu.memory_space<vmem>>, vector<8x256xf32>,
    %148 = vector.extract_strided_slice %135 {offsets = [0, 3], sizes = [8, 256], strides = [1, 1]} : vector<8x307xf32> to vector<8x256xf32>
    %c24_115 = arith.constant 24 : index
    %c0_116 = arith.constant 0 : index
    %149 = vector.load %arg2[%c24_115, %c0_116] : memref<200x256xf32, #tpu.memory_space<vmem>>, vector<8x256xf32>
    %150 = arith.mulf %148, %149 : vector<8x256xf32>
    %c24_117 = arith.constant 24 : index
    %c0_118 = arith.constant 0 : index
    %151 = vector.load %arg10[%c24_117, %c0_118] : memref<200x256xf32, #tpu.memory_space<vmem>>, vector<8x256xf32>
    tpu.vector_store %arg10[%c24_117, %c0_118], %150 {strides = array<i32>} : memref<200x256xf32, #tpu.memory_space<vmem>>, vector<8x256xf32>,
    %152 = vector.extract_strided_slice %135 {offsets = [0, 4], sizes = [8, 256], strides = [1, 1]} : vector<8x307xf32> to vector<8x256xf32>
    %c32_119 = arith.constant 32 : index
    %c0_120 = arith.constant 0 : index
    %153 = vector.load %arg2[%c32_119, %c0_120] : memref<200x256xf32, #tpu.memory_space<vmem>>, vector<8x256xf32>
    %154 = arith.mulf %152, %153 : vector<8x256xf32>
    %c32_121 = arith.constant 32 : index
    %c0_122 = arith.constant 0 : index
    %155 = vector.load %arg10[%c32_121, %c0_122] : memref<200x256xf32, #tpu.memory_space<vmem>>, vector<8x256xf32>
    tpu.vector_store %arg10[%c32_121, %c0_122], %154 {strides = array<i32>} : memref<200x256xf32, #tpu.memory_space<vmem>>, vector<8x256xf32>,
    %156 = vector.extract_strided_slice %135 {offsets = [0, 5], sizes = [8, 256], strides = [1, 1]} : vector<8x307xf32> to vector<8x256xf32>
    %c40_123 = arith.constant 40 : index
    %c0_124 = arith.constant 0 : index
    %157 = vector.load %arg2[%c40_123, %c0_124] : memref<200x256xf32, #tpu.memory_space<vmem>>, vector<8x256xf32>
    %158 = arith.mulf %156, %157 : vector<8x256xf32>
    %c40_125 = arith.constant 40 : index
    %c0_126 = arith.constant 0 : index
    %159 = vector.load %arg10[%c40_125, %c0_126] : memref<200x256xf32, #tpu.memory_space<vmem>>, vector<8x256xf32>
    tpu.vector_store %arg10[%c40_125, %c0_126], %158 {strides = array<i32>} : memref<200x256xf32, #tpu.memory_space<vmem>>, vector<8x256xf32>,
    %160 = vector.extract_strided_slice %135 {offsets = [0, 6], sizes = [8, 256], strides = [1, 1]} : vector<8x307xf32> to vector<8x256xf32>
    %c48_127 = arith.constant 48 : index
    %c0_128 = arith.constant 0 : index
    %161 = vector.load %arg2[%c48_127, %c0_128] : memref<200x256xf32, #tpu.memory_space<vmem>>, vector<8x256xf32>
    %162 = arith.mulf %160, %161 : vector<8x256xf32>
    %c48_129 = arith.constant 48 : index
    %c0_130 = arith.constant 0 : index
    %163 = vector.load %arg10[%c48_129, %c0_130] : memref<200x256xf32, #tpu.memory_space<vmem>>, vector<8x256xf32>
    tpu.vector_store %arg10[%c48_129, %c0_130], %162 {strides = array<i32>} : memref<200x256xf32, #tpu.memory_space<vmem>>, vector<8x256xf32>,
    %164 = vector.extract_strided_slice %135 {offsets = [0, 16], sizes = [8, 256], strides = [1, 1]} : vector<8x307xf32> to vector<8x256xf32>
    %c56_131 = arith.constant 56 : index
    %c0_132 = arith.constant 0 : index
    %165 = vector.load %arg2[%c56_131, %c0_132] : memref<200x256xf32, #tpu.memory_space<vmem>>, vector<8x256xf32>
    %166 = arith.mulf %164, %165 : vector<8x256xf32>
    %c56_133 = arith.constant 56 : index
    %c0_134 = arith.constant 0 : index
    %167 = vector.load %arg10[%c56_133, %c0_134] : memref<200x256xf32, #tpu.memory_space<vmem>>, vector<8x256xf32>
    tpu.vector_store %arg10[%c56_133, %c0_134], %166 {strides = array<i32>} : memref<200x256xf32, #tpu.memory_space<vmem>>, vector<8x256xf32>,
    %168 = vector.extract_strided_slice %135 {offsets = [0, 17], sizes = [8, 256], strides = [1, 1]} : vector<8x307xf32> to vector<8x256xf32>
    %c64_135 = arith.constant 64 : index
    %c0_136 = arith.constant 0 : index
    %169 = vector.load %arg2[%c64_135, %c0_136] : memref<200x256xf32, #tpu.memory_space<vmem>>, vector<8x256xf32>
    %170 = arith.mulf %168, %169 : vector<8x256xf32>
    %c64_137 = arith.constant 64 : index
    %c0_138 = arith.constant 0 : index
    %171 = vector.load %arg10[%c64_137, %c0_138] : memref<200x256xf32, #tpu.memory_space<vmem>>, vector<8x256xf32>
    tpu.vector_store %arg10[%c64_137, %c0_138], %170 {strides = array<i32>} : memref<200x256xf32, #tpu.memory_space<vmem>>, vector<8x256xf32>,
    %172 = vector.extract_strided_slice %135 {offsets = [0, 18], sizes = [8, 256], strides = [1, 1]} : vector<8x307xf32> to vector<8x256xf32>
    %c72_139 = arith.constant 72 : index
    %c0_140 = arith.constant 0 : index
    %173 = vector.load %arg2[%c72_139, %c0_140] : memref<200x256xf32, #tpu.memory_space<vmem>>, vector<8x256xf32>
    %174 = arith.mulf %172, %173 : vector<8x256xf32>
    %c72_141 = arith.constant 72 : index
    %c0_142 = arith.constant 0 : index
    %175 = vector.load %arg10[%c72_141, %c0_142] : memref<200x256xf32, #tpu.memory_space<vmem>>, vector<8x256xf32>
    tpu.vector_store %arg10[%c72_141, %c0_142], %174 {strides = array<i32>} : memref<200x256xf32, #tpu.memory_space<vmem>>, vector<8x256xf32>,
    %176 = vector.extract_strided_slice %135 {offsets = [0, 19], sizes = [8, 256], strides = [1, 1]} : vector<8x307xf32> to vector<8x256xf32>
    %c80_143 = arith.constant 80 : index
    %c0_144 = arith.constant 0 : index
    %177 = vector.load %arg2[%c80_143, %c0_144] : memref<200x256xf32, #tpu.memory_space<vmem>>, vector<8x256xf32>
    %178 = arith.mulf %176, %177 : vector<8x256xf32>
    %c80_145 = arith.constant 80 : index
    %c0_146 = arith.constant 0 : index
    %179 = vector.load %arg10[%c80_145, %c0_146] : memref<200x256xf32, #tpu.memory_space<vmem>>, vector<8x256xf32>
    tpu.vector_store %arg10[%c80_145, %c0_146], %178 {strides = array<i32>} : memref<200x256xf32, #tpu.memory_space<vmem>>, vector<8x256xf32>,
    %180 = vector.extract_strided_slice %135 {offsets = [0, 20], sizes = [8, 256], strides = [1, 1]} : vector<8x307xf32> to vector<8x256xf32>
    %c88_147 = arith.constant 88 : index
    %c0_148 = arith.constant 0 : index
    %181 = vector.load %arg2[%c88_147, %c0_148] : memref<200x256xf32, #tpu.memory_space<vmem>>, vector<8x256xf32>
    %182 = arith.mulf %180, %181 : vector<8x256xf32>
    %c88_149 = arith.constant 88 : index
    %c0_150 = arith.constant 0 : index
    %183 = vector.load %arg10[%c88_149, %c0_150] : memref<200x256xf32, #tpu.memory_space<vmem>>, vector<8x256xf32>
    tpu.vector_store %arg10[%c88_149, %c0_150], %182 {strides = array<i32>} : memref<200x256xf32, #tpu.memory_space<vmem>>, vector<8x256xf32>,
    %184 = vector.extract_strided_slice %135 {offsets = [0, 21], sizes = [8, 256], strides = [1, 1]} : vector<8x307xf32> to vector<8x256xf32>
    %c96_151 = arith.constant 96 : index
    %c0_152 = arith.constant 0 : index
    %185 = vector.load %arg2[%c96_151, %c0_152] : memref<200x256xf32, #tpu.memory_space<vmem>>, vector<8x256xf32>
    %186 = arith.mulf %184, %185 : vector<8x256xf32>
    %c96_153 = arith.constant 96 : index
    %c0_154 = arith.constant 0 : index
    %187 = vector.load %arg10[%c96_153, %c0_154] : memref<200x256xf32, #tpu.memory_space<vmem>>, vector<8x256xf32>
    tpu.vector_store %arg10[%c96_153, %c0_154], %186 {strides = array<i32>} : memref<200x256xf32, #tpu.memory_space<vmem>>, vector<8x256xf32>,
    %188 = vector.extract_strided_slice %135 {offsets = [0, 22], sizes = [8, 256], strides = [1, 1]} : vector<8x307xf32> to vector<8x256xf32>
    %c104_155 = arith.constant 104 : index
    %c0_156 = arith.constant 0 : index
    %189 = vector.load %arg2[%c104_155, %c0_156] : memref<200x256xf32, #tpu.memory_space<vmem>>, vector<8x256xf32>
    %190 = arith.mulf %188, %189 : vector<8x256xf32>
    %c104_157 = arith.constant 104 : index
    %c0_158 = arith.constant 0 : index
    %191 = vector.load %arg10[%c104_157, %c0_158] : memref<200x256xf32, #tpu.memory_space<vmem>>, vector<8x256xf32>
    tpu.vector_store %arg10[%c104_157, %c0_158], %190 {strides = array<i32>} : memref<200x256xf32, #tpu.memory_space<vmem>>, vector<8x256xf32>,
    %192 = vector.extract_strided_slice %135 {offsets = [0, 32], sizes = [8, 256], strides = [1, 1]} : vector<8x307xf32> to vector<8x256xf32>
    %c112_159 = arith.constant 112 : index
    %c0_160 = arith.constant 0 : index
    %193 = vector.load %arg2[%c112_159, %c0_160] : memref<200x256xf32, #tpu.memory_space<vmem>>, vector<8x256xf32>
    %194 = arith.mulf %192, %193 : vector<8x256xf32>
    %c112_161 = arith.constant 112 : index
    %c0_162 = arith.constant 0 : index
    %195 = vector.load %arg10[%c112_161, %c0_162] : memref<200x256xf32, #tpu.memory_space<vmem>>, vector<8x256xf32>
    tpu.vector_store %arg10[%c112_161, %c0_162], %194 {strides = array<i32>} : memref<200x256xf32, #tpu.memory_space<vmem>>, vector<8x256xf32>,
    %196 = vector.extract_strided_slice %135 {offsets = [0, 33], sizes = [8, 256], strides = [1, 1]} : vector<8x307xf32> to vector<8x256xf32>
    %c120_163 = arith.constant 120 : index
    %c0_164 = arith.constant 0 : index
    %197 = vector.load %arg2[%c120_163, %c0_164] : memref<200x256xf32, #tpu.memory_space<vmem>>, vector<8x256xf32>
    %198 = arith.mulf %196, %197 : vector<8x256xf32>
    %c120_165 = arith.constant 120 : index
    %c0_166 = arith.constant 0 : index
    %199 = vector.load %arg10[%c120_165, %c0_166] : memref<200x256xf32, #tpu.memory_space<vmem>>, vector<8x256xf32>
    tpu.vector_store %arg10[%c120_165, %c0_166], %198 {strides = array<i32>} : memref<200x256xf32, #tpu.memory_space<vmem>>, vector<8x256xf32>,
    %200 = vector.extract_strided_slice %135 {offsets = [0, 34], sizes = [8, 256], strides = [1, 1]} : vector<8x307xf32> to vector<8x256xf32>
    %c128_167 = arith.constant 128 : index
    %c0_168 = arith.constant 0 : index
    %201 = vector.load %arg2[%c128_167, %c0_168] : memref<200x256xf32, #tpu.memory_space<vmem>>, vector<8x256xf32>
    %202 = arith.mulf %200, %201 : vector<8x256xf32>
    %c128_169 = arith.constant 128 : index
    %c0_170 = arith.constant 0 : index
    %203 = vector.load %arg10[%c128_169, %c0_170] : memref<200x256xf32, #tpu.memory_space<vmem>>, vector<8x256xf32>
    tpu.vector_store %arg10[%c128_169, %c0_170], %202 {strides = array<i32>} : memref<200x256xf32, #tpu.memory_space<vmem>>, vector<8x256xf32>,
    %204 = vector.extract_strided_slice %135 {offsets = [0, 35], sizes = [8, 256], strides = [1, 1]} : vector<8x307xf32> to vector<8x256xf32>
    %c136_171 = arith.constant 136 : index
    %c0_172 = arith.constant 0 : index
    %205 = vector.load %arg2[%c136_171, %c0_172] : memref<200x256xf32, #tpu.memory_space<vmem>>, vector<8x256xf32>
    %206 = arith.mulf %204, %205 : vector<8x256xf32>
    %c136_173 = arith.constant 136 : index
    %c0_174 = arith.constant 0 : index
    %207 = vector.load %arg10[%c136_173, %c0_174] : memref<200x256xf32, #tpu.memory_space<vmem>>, vector<8x256xf32>
    tpu.vector_store %arg10[%c136_173, %c0_174], %206 {strides = array<i32>} : memref<200x256xf32, #tpu.memory_space<vmem>>, vector<8x256xf32>,
    %208 = vector.extract_strided_slice %135 {offsets = [0, 36], sizes = [8, 256], strides = [1, 1]} : vector<8x307xf32> to vector<8x256xf32>
    %c144_175 = arith.constant 144 : index
    %c0_176 = arith.constant 0 : index
    %209 = vector.load %arg2[%c144_175, %c0_176] : memref<200x256xf32, #tpu.memory_space<vmem>>, vector<8x256xf32>
    %210 = arith.mulf %208, %209 : vector<8x256xf32>
    %c144_177 = arith.constant 144 : index
    %c0_178 = arith.constant 0 : index
    %211 = vector.load %arg10[%c144_177, %c0_178] : memref<200x256xf32, #tpu.memory_space<vmem>>, vector<8x256xf32>
    tpu.vector_store %arg10[%c144_177, %c0_178], %210 {strides = array<i32>} : memref<200x256xf32, #tpu.memory_space<vmem>>, vector<8x256xf32>,
    %212 = vector.extract_strided_slice %135 {offsets = [0, 37], sizes = [8, 256], strides = [1, 1]} : vector<8x307xf32> to vector<8x256xf32>
    %c152_179 = arith.constant 152 : index
    %c0_180 = arith.constant 0 : index
    %213 = vector.load %arg2[%c152_179, %c0_180] : memref<200x256xf32, #tpu.memory_space<vmem>>, vector<8x256xf32>
    %214 = arith.mulf %212, %213 : vector<8x256xf32>
    %c152_181 = arith.constant 152 : index
    %c0_182 = arith.constant 0 : index
    %215 = vector.load %arg10[%c152_181, %c0_182] : memref<200x256xf32, #tpu.memory_space<vmem>>, vector<8x256xf32>
    tpu.vector_store %arg10[%c152_181, %c0_182], %214 {strides = array<i32>} : memref<200x256xf32, #tpu.memory_space<vmem>>, vector<8x256xf32>,
    %216 = vector.extract_strided_slice %135 {offsets = [0, 38], sizes = [8, 256], strides = [1, 1]} : vector<8x307xf32> to vector<8x256xf32>
    %c160_183 = arith.constant 160 : index
    %c0_184 = arith.constant 0 : index
    %217 = vector.load %arg2[%c160_183, %c0_184] : memref<200x256xf32, #tpu.memory_space<vmem>>, vector<8x256xf32>
    %218 = arith.mulf %216, %217 : vector<8x256xf32>
    %c160_185 = arith.constant 160 : index
    %c0_186 = arith.constant 0 : index
    %219 = vector.load %arg10[%c160_185, %c0_186] : memref<200x256xf32, #tpu.memory_space<vmem>>, vector<8x256xf32>
    tpu.vector_store %arg10[%c160_185, %c0_186], %218 {strides = array<i32>} : memref<200x256xf32, #tpu.memory_space<vmem>>, vector<8x256xf32>,
    %220 = vector.extract_strided_slice %135 {offsets = [0, 48], sizes = [8, 256], strides = [1, 1]} : vector<8x307xf32> to vector<8x256xf32>
    %c168_187 = arith.constant 168 : index
    %c0_188 = arith.constant 0 : index
    %221 = vector.load %arg2[%c168_187, %c0_188] : memref<200x256xf32, #tpu.memory_space<vmem>>, vector<8x256xf32>
    %222 = arith.mulf %220, %221 : vector<8x256xf32>
    %c168_189 = arith.constant 168 : index
    %c0_190 = arith.constant 0 : index
    %223 = vector.load %arg10[%c168_189, %c0_190] : memref<200x256xf32, #tpu.memory_space<vmem>>, vector<8x256xf32>
    tpu.vector_store %arg10[%c168_189, %c0_190], %222 {strides = array<i32>} : memref<200x256xf32, #tpu.memory_space<vmem>>, vector<8x256xf32>,
    %224 = vector.extract_strided_slice %135 {offsets = [0, 49], sizes = [8, 256], strides = [1, 1]} : vector<8x307xf32> to vector<8x256xf32>
    %c176_191 = arith.constant 176 : index
    %c0_192 = arith.constant 0 : index
    %225 = vector.load %arg2[%c176_191, %c0_192] : memref<200x256xf32, #tpu.memory_space<vmem>>, vector<8x256xf32>
    %226 = arith.mulf %224, %225 : vector<8x256xf32>
    %c176_193 = arith.constant 176 : index
    %c0_194 = arith.constant 0 : index
    %227 = vector.load %arg10[%c176_193, %c0_194] : memref<200x256xf32, #tpu.memory_space<vmem>>, vector<8x256xf32>
    tpu.vector_store %arg10[%c176_193, %c0_194], %226 {strides = array<i32>} : memref<200x256xf32, #tpu.memory_space<vmem>>, vector<8x256xf32>,
    %228 = vector.extract_strided_slice %135 {offsets = [0, 50], sizes = [8, 256], strides = [1, 1]} : vector<8x307xf32> to vector<8x256xf32>
    %c184_195 = arith.constant 184 : index
    %c0_196 = arith.constant 0 : index
    %229 = vector.load %arg2[%c184_195, %c0_196] : memref<200x256xf32, #tpu.memory_space<vmem>>, vector<8x256xf32>
    %230 = arith.mulf %228, %229 : vector<8x256xf32>
    %c184_197 = arith.constant 184 : index
    %c0_198 = arith.constant 0 : index
    %231 = vector.load %arg10[%c184_197, %c0_198] : memref<200x256xf32, #tpu.memory_space<vmem>>, vector<8x256xf32>
    tpu.vector_store %arg10[%c184_197, %c0_198], %230 {strides = array<i32>} : memref<200x256xf32, #tpu.memory_space<vmem>>, vector<8x256xf32>,
    %232 = vector.extract_strided_slice %135 {offsets = [0, 51], sizes = [8, 256], strides = [1, 1]} : vector<8x307xf32> to vector<8x256xf32>
    %c192_199 = arith.constant 192 : index
    %c0_200 = arith.constant 0 : index
    %233 = vector.load %arg10[%c192_199, %c0_200] : memref<200x256xf32, #tpu.memory_space<vmem>>, vector<8x256xf32>
    tpu.vector_store %arg10[%c192_199, %c0_200], %232 {strides = array<i32>} : memref<200x256xf32, #tpu.memory_space<vmem>>, vector<8x256xf32>,
    %c0_201 = arith.constant 0 : index
    %c0_202 = arith.constant 0 : index
    %234 = vector.load %arg5[%c0_201, %c0_202] : memref<8x200xf32, #tpu.memory_space<vmem>>, vector<8x200xf32>
    %c0_203 = arith.constant 0 : index
    %c0_204 = arith.constant 0 : index
    %235 = vector.load %arg10[%c0_203, %c0_204] : memref<200x256xf32, #tpu.memory_space<vmem>>, vector<200x256xf32>
    %cst_205 = arith.constant dense<0.000000e+00> : vector<8x256xf32>
    %236 = tpu.matmul %234, %235, %cst_205 {dimension_numbers = #tpu.dot_dimension_numbers<[1], [0], [0], [1], [0, 0, 1, 1], [], []>} : vector<8x200xf32>, vector<200x256xf32>, vector<8x256xf32> -> vector<8x256xf32>
    %c0_206 = arith.constant 0 : index
    %c0_207 = arith.constant 0 : index
    %237 = vector.load %arg6[%c0_206, %c0_207] : memref<8x1xf32, #tpu.memory_space<vmem>>, vector<8x1xf32>
    %238 = vector.broadcast %237 : vector<8x1xf32> to vector<8x256xf32>
    %239 = arith.addf %236, %238 : vector<8x256xf32>
    %cst_208 = arith.constant 0.000000e+00 : f32
    %240 = vector.broadcast %cst_208 : f32 to vector<8x256xf32>
    %241 = arith.maximumf %239, %240 : vector<8x256xf32>
    %cst_209 = arith.constant dense<0.000000e+00> : vector<6x256xf32>
    %242 = tpu.matmul %2, %241, %cst_209 {dimension_numbers = #tpu.dot_dimension_numbers<[1], [0], [0], [1], [0, 0, 1, 1], [], []>} : vector<6x8xf32>, vector<8x256xf32>, vector<6x256xf32> -> vector<6x256xf32>
    %243 = vector.broadcast %3 : vector<6x1xf32> to vector<6x256xf32>
    %244 = arith.addf %242, %243 : vector<6x256xf32>
    %cst_210 = arith.constant 0.000000e+00 : f32
    %245 = vector.broadcast %cst_210 : f32 to vector<6x256xf32>
    %246 = arith.maximumf %244, %245 : vector<6x256xf32>
    %247 = arith.addf %246, %129 : vector<6x256xf32>
    %c1_211 = arith.constant 1 : index
    %c0_212 = arith.constant 0 : index
    %c0_213 = arith.constant 0 : index
    %248 = vector.load %arg9[%c1_211, %c0_212, %c0_213] : memref<2x6x256xf32, #tpu.memory_space<vmem>>, vector<1x6x256xf32>
    %249 = vector.shape_cast %248 : vector<1x6x256xf32> to vector<6x256xf32>
    %250 = vector.shape_cast %247 : vector<6x256xf32> to vector<1x6x256xf32>
    tpu.vector_store %arg9[%c1_211, %c0_212, %c0_213], %250 {strides = array<i32>} : memref<2x6x256xf32, #tpu.memory_space<vmem>>, vector<1x6x256xf32>,
    return
  }
  func.func @transform_0(%arg0: i32) -> (i32, i32, i32) {
    %c0_i32 = arith.constant 0 : i32
    %c0_i32_0 = arith.constant 0 : i32
    %c0_i32_1 = arith.constant 0 : i32
    return %arg0, %c0_i32, %c0_i32_0 : i32, i32, i32
  }
  func.func @transform_1(%arg0: i32) -> (i32, i32) {
    %c0_i32 = arith.constant 0 : i32
    %c0_i32_0 = arith.constant 0 : i32
    %c0_i32_1 = arith.constant 0 : i32
    return %c0_i32, %c0_i32_0 : i32, i32
  }
  func.func @transform_2(%arg0: i32) -> (i32, i32) {
    %c0_i32 = arith.constant 0 : i32
    %c0_i32_0 = arith.constant 0 : i32
    %c0_i32_1 = arith.constant 0 : i32
    return %c0_i32, %c0_i32_0 : i32, i32
  }
  func.func @transform_3(%arg0: i32) -> (i32, i32) {
    %c0_i32 = arith.constant 0 : i32
    %c0_i32_0 = arith.constant 0 : i32
    %c0_i32_1 = arith.constant 0 : i32
    return %c0_i32, %c0_i32_0 : i32, i32
  }
  func.func @transform_4(%arg0: i32) -> (i32, i32) {
    %c0_i32 = arith.constant 0 : i32
    %c0_i32_0 = arith.constant 0 : i32
    %c0_i32_1 = arith.constant 0 : i32
    return %c0_i32, %c0_i32_0 : i32, i32
  }
  func.func @transform_5(%arg0: i32) -> (i32, i32) {
    %c0_i32 = arith.constant 0 : i32
    %c0_i32_0 = arith.constant 0 : i32
    %c0_i32_1 = arith.constant 0 : i32
    return %c0_i32, %c0_i32_0 : i32, i32
  }
  func.func @transform_6(%arg0: i32) -> (i32, i32) {
    %c0_i32 = arith.constant 0 : i32
    %c0_i32_0 = arith.constant 0 : i32
    %c0_i32_1 = arith.constant 0 : i32
    return %c0_i32, %c0_i32_0 : i32, i32
  }
  func.func @transform_7(%arg0: i32) -> (i32, i32) {
    %c0_i32 = arith.constant 0 : i32
    %c0_i32_0 = arith.constant 0 : i32
    %c0_i32_1 = arith.constant 0 : i32
    return %c0_i32, %c0_i32_0 : i32, i32
  }
  func.func @transform_8(%arg0: i32) -> (i32, i32, i32) {
    %c0_i32 = arith.constant 0 : i32
    %c0_i32_0 = arith.constant 0 : i32
    %c0_i32_1 = arith.constant 0 : i32
    return %arg0, %c0_i32, %c0_i32_0 : i32, i32, i32
  }
}

</mosaic_0001>

<bundles_post_ra>
// kernel: tpu_custom_call.1
= control target key start
LH: loop header
LB: loop body
LE: loop exit
PB: predicated region body
PF: predicated region fallthrough
CT: control target
= control target key end

     0   :  { %13 = vsyncpa [#allocation4], 0  ;;  %s2566_s27 = smov [#allocation3]   ;;  %s3721_s0 = inlined_call_operand.vmem [shape: f32[2,6,256], index: 0, kind: input, shape index: {}]   ;;  %s3722_s1 = inlined_call_operand.hbm [shape: f32[200,256], index: 1, kind: input, shape index: {}]   ;;  %s3723_s2 = inlined_call_operand.vmem [shape: f32[8,6], index: 2, kind: input, shape index: {}]   ;;  %s3724_s3 = inlined_call_operand.vmem [shape: f32[8,1], index: 3, kind: input, shape index: {}]   ;;  %s3725_s4 = inlined_call_operand.vmem [shape: f32[8,200], index: 4, kind: input, shape index: {}]   ;;  %s3726_s5 = inlined_call_operand.vmem [shape: f32[8,1], index: 5, kind: input, shape index: {}]   ;;  %s3727_s6 = inlined_call_operand.vmem [shape: f32[6,8], index: 6, kind: input, shape index: {}]   ;;  %s3728_s7 = inlined_call_operand.vmem [shape: f32[6,1], index: 7, kind: input, shape index: {}]   ;;  %s3729_s8 = inlined_call_operand.vmem [shape: f32[2,6,256], index: 8, kind: output, shape index: {}]  }
   0x1   :  { %s21_s28 = sshll.u32 %s2566_s27, 4  ;;  %s2542_s9 = scalar_lea.hbm %s3722_s1, 6400  ;;  %s22_s28 = int_to_ptr.vmem [resolvable:$true] %s21_s28 }
   0x2   :  { %p2543_p0 = scmp.ne.s32.totalorder %s3722_s1, %s2542_s9  ;;  %p2546_p1 = scmp.lt.u32.totalorder %s2542_s9, %s3722_s1 }
   0x4   :  { %p2548_p2 = pnand %p2546_p1, %p2543_p0 }
   0x6   :  { %2551 = shalt.err (!%p2548_p2)
}
   0x7   :  { %s2552_s14 = scalar_lea.vmem %s22_s28, 6400  ;;  %p2557_p4 = scmp.lt.s32.totalorder %s22_s28, %s22_s28 }
   0x8   :  { %p2553_p3 = scmp.ne.s32.totalorder %s22_s28, %s2552_s14  ;;  %p2558_p5 = scmp.lt.s32.totalorder %s2552_s14, %s2552_s14 }
   0xa   :  { %p2559_p6 = por %p2558_p5, %p2557_p4 }
   0xc   :  { %p2560_p7 = pnand %p2559_p6, %p2553_p3 }
   0xe   :  { %2563 = shalt.err (!%p2560_p7)
}
   0xf   :  { %s2567_s15 = smov 256   ;;  %s3764_s16 = smov 16  }
  0x10   :  { %27 = dma.hbm_to_vmem [thread:$0]  %s3722_s1, 6400, %s22_s28, [#allocation4], %s2567_s15, %s2567_s15, %s3764_s16  }
  0x11   :  { %2564 = dma.done.wait [#allocation4], 6400  }
  0x12   :  { %2565 = vsyncadd [#allocation4], 4294960896  ;;  %v2569_v0 = vmov 0.0   ;;  %v2570_v1 = vmov 0   ;;  %vm58_vm0 = vcmask 1045504   ;;  %vm54_vm1 = vcmask 48128  }
  0x13   :  { %129 = vmatprep.mubr.f32.mxu1 %v2569_v0  ;;  %2307 = vset.pattern.permute.xlu0 %v2570_v1  ;;  %v48_v2 = vld [vmem:[%s3721_s0 + $0x8] sm:$0x3f]  ;;  %v47_v3 = vld [vmem:[%s3721_s0] sm:$0x3f]  ;;  %v156_v6 = vld [vmem:[#allocation3 + $0x10] sm:$0xff]  ;;  %s2571_s26 = smov 1  }
  0x14   :  { %1113 = vmatprep.mubr.f32.mxu0 %v2569_v0  ;;  %2538 = vset.pattern.permute.xlu1 %v2570_v1  ;;  %v43_v4 = vld [vmem:[%s3723_s2] sm:$0xff]  ;;  %v157_v7 = vld [vmem:[#allocation3 + $0x18] sm:$0xff]  ;;  %s2572_s27 = smov 2   ;;  %v189_v9 = vld [vmem:[#allocation3 + $0x28] sm:$0xff]  ;;  %s3770_s28 = smov 4   ;;  %vm144_vm2 = vcmask 416768  }
  0x15   :  { %2145 = vmatprep.subr.msk.mxu1 %vm58_vm0, %v48_v2  ;;  %v44_v5 = vld [vmem:[%s3724_s3] sm:$0xff]  ;;  %160 = vrot.lane.b32.xlu1 %v156_v6, %s2571_s26  ;;  %v220_v10 = vld [vmem:[#allocation3 + $0x30] sm:$0xff]  ;;  %s3772_s3 = smov 3   ;;  %v221_v11 = vld [vmem:[#allocation3 + $0x38] sm:$0xff]  ;;  %s3768_s29 = smov 5   ;;  %vm228_vm3 = vcmask 23552  }
  0x16   :  { %2146 = vmatpush1.msk.msra.mxu1 %vm58_vm0, %v47_v3  ;;  %51 = vperm.xlu0 %2307, %v44_v5   ;;  %v188_v8 = vld [vmem:[#allocation3 + $0x20] sm:$0xff]  ;;  %v253_v13 = vld [vmem:[#allocation3 + $0x48] sm:$0xff]  ;;  %v284_v14 = vld [vmem:[#allocation3 + $0x50] sm:$0xff]  ;;  %s3766_s30 = smov 6   ;;  %s3762_s9 = smov 17   ;;  %vm164_vm4 = vcmask 7168  }
  0x17   :  { %2147 = vmatmul.mubr.msk.f32.vlgmr.msra.gmra.mrb[0].mxu1 %vm54_vm1, %v43_v4  ;;  %v252_v12 = vld [vmem:[#allocation3 + $0x40] sm:$0xff]  ;;  %v285_v15 = vld [vmem:[#allocation3 + $0x58] sm:$0xff]  ;;  %v317_v17 = vld [vmem:[#allocation3 + $0x68] sm:$0xff]  ;;  %s3760_s10 = smov 18   ;;  %s3758_s11 = smov 19   ;;  %vm196_vm5 = vcmask 15360  }
  0x18   :  { %v316_v16 = vld [vmem:[#allocation3 + $0x60] sm:$0xff]  ;;  %v347_v18 = vld [vmem:[#allocation3 + $0x70] sm:$0xff]  ;;  %v348_v19 = vld [vmem:[#allocation3 + $0x78] sm:$0xff]  ;;  %s3756_s12 = smov 20   ;;  %s3754_s13 = smov 21   ;;  %vm292_vm6 = vcmask 39936  }
  0x19   :  { %192 = vrot.lane.b32.xlu1 %v188_v8, %s2572_s27  ;;  %v379_v20 = vld [vmem:[#allocation3 + $0x80] sm:$0xff]  ;;  %v380_v21 = vld [vmem:[#allocation3 + $0x88] sm:$0xff]  ;;  %v411_v22 = vld [vmem:[#allocation3 + $0x90] sm:$0xff]  ;;  %s3752_s14 = smov 22   ;;  %s3750_s15 = smov 32   ;;  %vm260_vm7 = vcmask 31744  }
  0x1a   :  { %162 = vrot.lane.b32.xlu0 %v157_v7, %s2571_s26  ;;  %v412_v23 = vld [vmem:[#allocation3 + $0x98] sm:$0xff]  ;;  %v443_v24 = vld [vmem:[#allocation3 + $0xa0] sm:$0xff]  ;;  %v444_v25 = vld [vmem:[#allocation3 + $0xa8] sm:$0xff]  ;;  %s3748_s17 = smov 33   ;;  %s3746_s18 = smov 34   ;;  %vm355_vm8 = vcmask 130048  }
  0x1b   :  { %v475_v26 = vld [vmem:[#allocation3 + $0xb0] sm:$0xff]  ;;  %v476_v27 = vld [vmem:[#allocation3 + $0xb8] sm:$0xff]  ;;  %v507_v28 = vld [vmem:[#allocation3 + $0xc0] sm:$0xff]  ;;  %s3744_s19 = smov 35   ;;  %s3742_s20 = smov 36   ;;  %vm419_vm9 = vcmask 146432  }
  0x1c   :  { %v508_v29 = vld [vmem:[#allocation3 + $0xc8] sm:$0xff]  ;;  %v539_v30 = vld [vmem:[#allocation3 + $0xd0] sm:$0xff]  ;;  %v540_v31 = vld [vmem:[#allocation3 + $0xd8] sm:$0xff]  ;;  %s3740_s21 = smov 37   ;;  %s3738_s22 = smov 38   ;;  %vm3777_vm10 = vcmask 138240  }
  0x1d   :  { %224 = vrot.lane.b32.xlu1 %v220_v10, %s3772_s3  ;;  %v571_v32 = vld [vmem:[#allocation3 + $0xe0] sm:$0xff]  ;;  %v572_v33 = vld [vmem:[#allocation3 + $0xe8] sm:$0xff]  ;;  %v603_v34 = vld [vmem:[#allocation3 + $0xf0] sm:$0xff]  ;;  %s3736_s1 = smov 51   ;;  %s3734_s23 = smov 48   ;;  %vm483_vm11 = vcmask 162816  }
  0x1e   :  { %194 = vrot.lane.b32.xlu0 %v189_v9, %s2572_s27  ;;  %v604_v35 = vld [vmem:[#allocation3 + $0xf8] sm:$0xff]  ;;  %v635_v36 = vld [vmem:[#allocation3 + $0x100] sm:$0xff]  ;;  %v636_v37 = vld [vmem:[#allocation3 + $0x108] sm:$0xff]  ;;  %s3732_s24 = smov 49   ;;  %s3730_s25 = smov 50   ;;  %vm3775_vm12 = vcmask 154624  }
  0x1f   :  { %v667_v38 = vld [vmem:[#allocation3 + $0x110] sm:$0xff]  ;;  %v668_v39 = vld [vmem:[#allocation3 + $0x118] sm:$0xff]  ;;  %v699_v40 = vld [vmem:[#allocation3 + $0x120] sm:$0xff]  ;;  %vm3774_vm13 = vcmask 179200   ;;  %vm3778_vm14 = vcmask 171008   ;;  %vm3776_vm15 = vcmask 269312  }
  0x20   :  { %v700_v41 = vld [vmem:[#allocation3 + $0x128] sm:$0xff]  ;;  %v731_v42 = vld [vmem:[#allocation3 + $0x130] sm:$0xff]  ;;  %v732_v43 = vld [vmem:[#allocation3 + $0x138] sm:$0xff] }
  0x21   :  { %256 = vrot.lane.b32.xlu1 %v252_v12, %s3770_s28  ;;  %v763_v44 = vld [vmem:[#allocation3 + $0x140] sm:$0xff]  ;;  %v764_v53 = vld [vmem:[#allocation3 + $0x148] sm:$0xff]  ;;  %v795_v54 = vld [vmem:[#allocation3 + $0x150] sm:$0xff] }
  0x22   :  { %226 = vrot.lane.b32.xlu0 %v221_v11, %s3772_s3  ;;  %v796_v55 = vld [vmem:[#allocation3 + $0x158] sm:$0xff]  ;;  %v827_v56 = vld [vmem:[#allocation3 + $0x160] sm:$0xff]  ;;  %v828_v58 = vld [vmem:[#allocation3 + $0x168] sm:$0xff]  ;;  %s3790_s3 = smov 80  }
  0x23   :  { %v859_v59 = vld [vmem:[#allocation3 + $0x170] sm:$0xff]  ;;  %v860_v61 = vld [vmem:[#allocation3 + $0x178] sm:$0xff] }
  0x25   :  { %288 = vrot.lane.b32.xlu1 %v284_v14, %s3768_s29 }
  0x26   :  { %258 = vrot.lane.b32.xlu0 %v253_v13, %s3770_s28  ;;  %s2614_s28 = smov 79  }
  0x29   :  { %320 = vrot.lane.b32.xlu1 %v316_v16, %s3766_s30 }
  0x2a   :  { %290 = vrot.lane.b32.xlu0 %v285_v15, %s3768_s29  ;;  %s3783_s29 = smov 91  }
  0x2d   :  { %351 = vrot.lane.b32.xlu1 %v347_v18, %s3764_s16 }
  0x2e   :  { %322 = vrot.lane.b32.xlu0 %v317_v17, %s3766_s30  ;;  %s3792_s30 = smov 90  }
  0x31   :  { %383 = vrot.lane.b32.xlu1 %v379_v20, %s3762_s9 }
  0x32   :  { %353 = vrot.lane.b32.xlu0 %v348_v19, %s3764_s16  ;;  %s3785_s16 = smov 93  }
  0x35   :  { %415 = vrot.lane.b32.xlu1 %v411_v22, %s3760_s10 }
  0x36   :  { %385 = vrot.lane.b32.xlu0 %v380_v21, %s3762_s9  ;;  %s2610_s9 = smov 92  }
  0x39   :  { %447 = vrot.lane.b32.xlu1 %v443_v24, %s3758_s11 }
  0x3a   :  { %417 = vrot.lane.b32.xlu0 %v412_v23, %s3760_s10  ;;  %s3787_s10 = smov 95  }
  0x3d   :  { %479 = vrot.lane.b32.xlu1 %v475_v26, %s3756_s12 }
  0x3e   :  { %449 = vrot.lane.b32.xlu0 %v444_v25, %s3758_s11  ;;  %s2608_s11 = smov 94  }
  0x41   :  { %511 = vrot.lane.b32.xlu1 %v507_v28, %s3754_s13 }
  0x42   :  { %481 = vrot.lane.b32.xlu0 %v476_v27, %s3756_s12  ;;  %s2607_s12 = smov 106  }
  0x45   :  { %543 = vrot.lane.b32.xlu1 %v539_v30, %s3752_s14 }
  0x46   :  { %513 = vrot.lane.b32.xlu0 %v508_v29, %s3754_s13  ;;  %s2606_s13 = smov 96  }
  0x49   :  { %575 = vrot.lane.b32.xlu1 %v571_v32, %s3750_s15 }
  0x4a   :  { %545 = vrot.lane.b32.xlu0 %v540_v31, %s3752_s14  ;;  %s2605_s14 = smov 108  }
  0x4d   :  { %607 = vrot.lane.b32.xlu1 %v603_v34, %s3748_s17 }
  0x4e   :  { %577 = vrot.lane.b32.xlu0 %v572_v33, %s3750_s15  ;;  %s2604_s15 = smov 107  }
  0x51   :  { %639 = vrot.lane.b32.xlu1 %v635_v36, %s3746_s18 }
  0x52   :  { %609 = vrot.lane.b32.xlu0 %v604_v35, %s3748_s17  ;;  %s2603_s17 = smov 110  }
  0x55   :  { %671 = vrot.lane.b32.xlu1 %v667_v38, %s3744_s19 }
  0x56   :  { %641 = vrot.lane.b32.xlu0 %v636_v37, %s3746_s18  ;;  %s2602_s18 = smov 109  }
  0x59   :  { %703 = vrot.lane.b32.xlu1 %v699_v40, %s3742_s20 }
  0x5a   :  { %673 = vrot.lane.b32.xlu0 %v668_v39, %s3744_s19  ;;  %s2601_s19 = smov 112  }
  0x5d   :  { %735 = vrot.lane.b32.xlu1 %v731_v42, %s3740_s21 }
  0x5e   :  { %705 = vrot.lane.b32.xlu0 %v700_v41, %s3742_s20  ;;  %s2600_s20 = smov 111  }
  0x61   :  { %767 = vrot.lane.b32.xlu1 %v763_v44, %s3738_s22 }
  0x62   :  { %737 = vrot.lane.b32.xlu0 %v732_v43, %s3740_s21  ;;  %s2599_s21 = smov 123  }
  0x87   :  { %v2753_v63 = vpop.permute.xlu1 %160 }
  0x8b   :  { %v2757_v2 = vpop.permute.xlu1 %192 }
  0x8f   :  { %v2761_v4 = vpop.permute.xlu1 %224 }
  0x93   :  { %v2765_v6 = vpop.permute.xlu1 %256 }
  0x95   :  { %v2732_v45 = vpop.permute.xlu0 %51 }
  0x97   :  { %v2769_v8 = vpop.permute.xlu1 %288 }
  0x99   :  { %v2737_v52 = vpop.permute.xlu0 %162 }
  0x9b   :  { %v2773_v10 = vpop.permute.xlu1 %320 }
  0x9d   :  { %v2742_v57 = vpop.permute.xlu0 %194 }
  0x9f   :  { %v2777_v12 = vpop.permute.xlu1 %351 }
  0xa1   :  { %v2747_v60 = vpop.permute.xlu0 %226 }
  0xa3   :  { %v2781_v14 = vpop.permute.xlu1 %383 }
  0xa5   :  { %v2751_v62 = vpop.permute.xlu0 %258 }
  0xa7   :  { %v2785_v16 = vpop.permute.xlu1 %415 }
  0xa9   :  { %v2755_v1 = vpop.permute.xlu0 %290 }
  0xab   :  { %v2789_v18 = vpop.permute.xlu1 %447 }
  0xad   :  { %v2759_v3 = vpop.permute.xlu0 %322 }
  0xaf   :  { %v2793_v20 = vpop.permute.xlu1 %479 }
  0xb1   :  { %v2763_v5 = vpop.permute.xlu0 %353 }
  0xb3   :  { %v2797_v22 = vpop.permute.xlu1 %511 }
  0xb5   :  { %v2767_v7 = vpop.permute.xlu0 %385 }
  0xb7   :  { %v2801_v24 = vpop.permute.xlu1 %543 }
  0xb9   :  { %v2771_v9 = vpop.permute.xlu0 %417 }
  0xbb   :  { %v2805_v26 = vpop.permute.xlu1 %575 }
  0xbd   :  { %v2775_v11 = vpop.permute.xlu0 %449 }
  0xbf   :  { %v2809_v28 = vpop.permute.xlu1 %607 }
  0xc1   :  { %v2779_v13 = vpop.permute.xlu0 %481 }
  0xc3   :  { %v2813_v30 = vpop.permute.xlu1 %639 }
  0xc5   :  { %v2783_v15 = vpop.permute.xlu0 %513 }
  0xc7   :  { %v2825_v35 = vpop.permute.xlu1 %671 }
  0xc9   :  { %v2787_v17 = vpop.permute.xlu0 %545 }
  0xcb   :  { %v2835_v38 = vpop.permute.xlu1 %703 }
  0xcd   :  { %v2791_v19 = vpop.permute.xlu0 %577 }
  0xcf   :  { %v2847_v43 = vpop.permute.xlu1 %735 }
  0xd1   :  { %v2795_v21 = vpop.permute.xlu0 %609 }
  0xd5   :  { %v2799_v23 = vpop.permute.xlu0 %641 }
  0xd9   :  { %v2803_v25 = vpop.permute.xlu0 %673 }
  0xdd   :  { %v2807_v27 = vpop.permute.xlu0 %705 }
  0xe1   :  { %v2811_v29 = vpop.permute.xlu0 %737 }
  0xea   :  { %v131_v46 = vpop.f32.mrb[0].mxu1 }
  0xeb   :  { %v132_v47 = vadd.f32 %v131_v46, %v2732_v45  ;;  %v133_v48 = vpop.f32.mrb[1].mxu1 }
  0xec   :  { %v134_v49 = vadd.f32 %v133_v48, %v2732_v45 }
  0xed   :  { %v136_v50 = vmax.f32 %v132_v47, 0.0  ;;  %v2857_v47 = vpop.permute.xlu1 %767 }
  0xee   :  { %v137_v51 = vmax.f32 %v134_v49, 0.0 }
  0xef   :  { %140 = vrot.lane.b32.xlu0 %v136_v50, %s3736_s1 }
  0xf0   :  { %142 = vrot.lane.b32.xlu1 %v137_v51, %s3736_s1  ;;  %s2597_s1 = smov 125  }
  0xf3   :  { %769 = vrot.lane.b32.xlu0 %v764_v53, %s3738_s22  ;;  %s2598_s22 = smov 122  }
  0xf4   :  { %799 = vrot.lane.b32.xlu1 %v795_v54, %s3734_s23 }
  0xf7   :  { %801 = vrot.lane.b32.xlu0 %v796_v55, %s3734_s23  ;;  %s2596_s23 = smov 124  }
  0xf8   :  { %831 = vrot.lane.b32.xlu1 %v827_v56, %s3732_s24 }
  0xfb   :  { %833 = vrot.lane.b32.xlu0 %v828_v58, %s3732_s24  ;;  %s2595_s24 = smov 127  }
  0xfc   :  { %863 = vrot.lane.b32.xlu1 %v859_v59, %s3730_s25 }
  0xff   :  { %865 = vrot.lane.b32.xlu0 %v860_v61, %s3730_s25  ;;  %s2594_s25 = smov 126  }
 0x161   :  { %v2815_v31 = vpop.permute.xlu0 %140 }
 0x162   :  { %v2819_v32 = vsel %vm144_vm2, 0.0, %v2815_v31  ;;  %v2869_v53 = vpop.permute.xlu1 %142 }
 0x163   :  { %v201_v33 = vmul.f32 %v2757_v2, %v2819_v32  ;;  %v169_v34 = vmul.f32 %v2753_v63, %v2819_v32  ;;  %v265_v36 = vmul.f32 %v2765_v6, %v2819_v32  ;;  %v233_v37 = vmul.f32 %v2761_v4, %v2819_v32 }
 0x164   :  { %v328_v39 = vmul.f32 %v2773_v10, %v2819_v32  ;;  %v297_v40 = vmul.f32 %v2769_v8, %v2819_v32  ;;  %v392_v41 = vmul.f32 %v2781_v14, %v2819_v32  ;;  %v360_v42 = vmul.f32 %v2777_v12, %v2819_v32 }
 0x165   :  { %207 = vrot.lane.b32.xlu1 %v201_v33, %s2594_s25  ;;  %175 = vrot.lane.b32.xlu0 %v169_v34, %s2595_s24  ;;  %v456_v44 = vmul.f32 %v2789_v18, %v2819_v32  ;;  %v424_v46 = vmul.f32 %v2785_v16, %v2819_v32  ;;  %v520_v48 = vmul.f32 %v2797_v22, %v2819_v32 }
 0x166   :  { %v488_v49 = vmul.f32 %v2793_v20, %v2819_v32  ;;  %v584_v50 = vmul.f32 %v2805_v26, %v2819_v32  ;;  %v552_v51 = vmul.f32 %v2801_v24, %v2819_v32  ;;  %v648_v54 = vmul.f32 %v2813_v30, %v2819_v32  ;;  %v2879_v56 = vpop.permute.xlu1 %799 }
 0x167   :  { %v616_v55 = vmul.f32 %v2809_v28, %v2819_v32  ;;  %v712_v58 = vmul.f32 %v2835_v38, %v2819_v32  ;;  %v680_v59 = vmul.f32 %v2825_v35, %v2819_v32  ;;  %v2890_v61 = vsel %vm144_vm2, %v2815_v31, %v2869_v53 }
 0x168   :  { %v776_v33 = vmul.f32 %v2857_v47, %v2819_v32  ;;  %v744_v34 = vmul.f32 %v2847_v43, %v2819_v32  ;;  %v165_v31 = vsel %vm164_vm4, %v2753_v63, %v2737_v52  ;;  %v293_v63 = vsel %vm292_vm6, %v2769_v8, %v2755_v1 }
 0x169   :  { %271 = vrot.lane.b32.xlu1 %v265_v36, %s2596_s23  ;;  %239 = vrot.lane.b32.xlu0 %v233_v37, %s2597_s1  ;;  %v229_v37 = vsel %vm228_vm3, %v2761_v4, %v2747_v60 }
 0x16a   :  { %v2896_v36 = vpop.permute.xlu1 %831 }
 0x16b   :  { %v840_v4 = vmul.f32 %v2896_v36, %v2819_v32 }
 0x16d   :  { %334 = vrot.lane.b32.xlu1 %v328_v39, %s2598_s22  ;;  %303 = vrot.lane.b32.xlu0 %v297_v40, %s2599_s21  ;;  %v234_v39 = vmul.f32 %v229_v37, %v2890_v61  ;;  %v235_v40 = vmul.f32 %v2747_v60, %v2869_v53  ;;  %v197_v60 = vsel %vm196_vm5, %v2757_v2, %v2742_v57 }
 0x16e   :  { %v202_v8 = vmul.f32 %v197_v60, %v2890_v61  ;;  %v261_v2 = vsel %vm260_vm7, %v2765_v6, %v2751_v62 }
 0x171   :  { %398 = vrot.lane.b32.xlu1 %v392_v41, %s2600_s20  ;;  %366 = vrot.lane.b32.xlu0 %v360_v42, %s2601_s19  ;;  %v808_v41 = vmul.f32 %v2879_v56, %v2819_v32  ;;  %v170_v42 = vmul.f32 %v165_v31, %v2890_v61  ;;  %v484_v31 = vsel %vm483_vm11, %v2793_v20, %v2779_v13 }
 0x175   :  { %462 = vrot.lane.b32.xlu1 %v456_v44, %s2602_s18  ;;  %430 = vrot.lane.b32.xlu0 %v424_v46, %s2603_s17  ;;  %v171_v44 = vmul.f32 %v2737_v52, %v2869_v53  ;;  %v2318_v46 = vpack.i.bf16 %v235_v40, %v234_v39  ;;  %v490_v39 = vmul.f32 %v2779_v13, %v2869_v53 }
 0x176   :  { %v452_v13 = vsel %vm3775_vm12, %v2789_v18, %v2775_v11  ;;  %v516_v18 = vsel %vm3778_vm14, %v2797_v22, %v2783_v15  ;;  %vm3779_vm12 = vcmask 285696   ;;  %vm3782_vm14 = vcmask 392192  }
 0x177   :  { %v2308_v52 = vpack.i.bf16 %v171_v44, %v170_v42  ;;  %v457_v60 = vmul.f32 %v452_v13, %v2890_v61  ;;  %v957_v13 = vld [vmem:[%s3726_s5] sm:$0xff] }
 0x179   :  { %526 = vrot.lane.b32.xlu1 %v520_v48, %s2604_s15  ;;  %494 = vrot.lane.b32.xlu0 %v488_v49, %s2605_s14  ;;  %v298_v48 = vmul.f32 %v293_v63, %v2890_v61  ;;  %v299_v49 = vmul.f32 %v2755_v1, %v2869_v53 }
 0x17d   :  { %590 = vrot.lane.b32.xlu1 %v584_v50, %s2606_s13  ;;  %558 = vrot.lane.b32.xlu0 %v552_v51, %s2607_s12  ;;  %v203_v50 = vmul.f32 %v2742_v57, %v2869_v53  ;;  %v356_v51 = vsel %vm355_vm8, %v2777_v12, %v2763_v5  ;;  %v267_v12 = vmul.f32 %v2751_v62, %v2869_v53 }
 0x17e   :  { %v361_v1 = vmul.f32 %v356_v51, %v2890_v61  ;;  %v426_v62 = vmul.f32 %v2771_v9, %v2869_v53 }
 0x17f   :  { %v2313_v57 = vpack.i.bf16 %v203_v50, %v202_v8  ;;  %v521_v8 = vmul.f32 %v516_v18, %v2890_v61  ;;  %v676_v50 = vsel %vm3779_vm12, %v2825_v35, %v2803_v25  ;;  %vm3797_vm12 = vcmask 293888  }
 0x180   :  { %v681_v22 = vmul.f32 %v676_v50, %v2890_v61 }
 0x181   :  { %654 = vrot.lane.b32.xlu1 %v648_v54, %s2608_s11  ;;  %622 = vrot.lane.b32.xlu0 %v616_v55, %s3787_s10  ;;  %v362_v54 = vmul.f32 %v2763_v5, %v2869_v53  ;;  %v2328_v55 = vpack.i.bf16 %v299_v49, %v298_v48  ;;  %v324_v5 = vsel %vm54_vm1, %v2773_v10, %v2759_v3 }
 0x182   :  { %v329_v37 = vmul.f32 %v324_v5, %v2890_v61  ;;  %v388_v10 = vsel %vm3777_vm10, %v2781_v14, %v2767_v7  ;;  %v548_v14 = vsel %vm3774_vm13, %v2801_v24, %v2787_v17  ;;  %v458_v24 = vmul.f32 %v2775_v11, %v2869_v53 }
 0x183   :  { %v2338_v6 = vpack.i.bf16 %v362_v54, %v361_v1  ;;  %v393_v20 = vmul.f32 %v388_v10, %v2890_v61  ;;  %v553_v44 = vmul.f32 %v548_v14, %v2890_v61  ;;  %vm3780_vm13 = vcmask 261120  }
 0x184   :  { %v618_v11 = vmul.f32 %v2795_v21, %v2869_v53  ;;  %v2353_v49 = vpack.i.bf16 %v458_v24, %v457_v60  ;;  %vm3801_vm10 = vcmask 302080   ;;  %v586_v54 = vmul.f32 %v2791_v19, %v2869_v53 }
 0x185   :  { %718 = vrot.lane.b32.xlu1 %v712_v58, %s2610_s9  ;;  %686 = vrot.lane.b32.xlu0 %v680_v59, %s3785_s16  ;;  %v266_v58 = vmul.f32 %v261_v2, %v2890_v61  ;;  %v420_v59 = vsel %vm419_vm9, %v2785_v16, %v2771_v9  ;;  %v330_v16 = vmul.f32 %v2759_v3, %v2869_v53  ;;  %v2969_v3 = vpop.permute.xlu0 %769 }
 0x186   :  { %v489_v9 = vmul.f32 %v484_v31, %v2890_v61 }
 0x188   :  { %v2358_v42 = vpack.i.bf16 %v490_v39, %v489_v9 }
 0x189   :  { %782 = vrot.lane.b32.xlu1 %v776_v33, %s3792_s30  ;;  %750 = vrot.lane.b32.xlu0 %v744_v34, %s3783_s29  ;;  %v425_v33 = vmul.f32 %v420_v59, %v2890_v61  ;;  %v2323_v34 = vpack.i.bf16 %v267_v12, %v266_v58  ;;  %v802_v48 = vpop.permute.xlu0 %801 }
 0x18b   :  { %v2348_v40 = vpack.i.bf16 %v426_v62, %v425_v33  ;;  %v864_v33 = vpop.permute.xlu1 %863 }
 0x18d   :  { %846 = vrot.lane.b32.xlu1 %v840_v4, %s2614_s28  ;;  %814 = vrot.lane.b32.xlu0 %v808_v41, %s3790_s3  ;;  %v2333_v41 = vpack.i.bf16 %v330_v16, %v329_v37  ;;  %v394_v4 = vmul.f32 %v2767_v7, %v2869_v53  ;;  %v554_v7 = vmul.f32 %v2787_v17, %v2869_v53  ;;  %v834_v51 = vpop.permute.xlu0 %833 }
 0x18e   :  { %v714_v37 = vmul.f32 %v2807_v27, %v2869_v53 }
 0x18f   :  { %v2343_v63 = vpack.i.bf16 %v394_v4, %v393_v20 }
 0x191   :  { %2319 = vrot.lane.b32.xlu0 %v2318_v46, %s2597_s1  ;;  %2309 = vrot.lane.b32.xlu1 %v2308_v52, %s2595_s24  ;;  %v612_v46 = vsel %vm3776_vm15, %v2809_v28, %v2795_v21  ;;  %v2368_v52 = vpack.i.bf16 %v554_v7, %v553_v44  ;;  %v522_v28 = vmul.f32 %v2783_v15, %v2869_v53  ;;  %vm3781_vm15 = vcmask 277504   ;;  %v866_v59 = vpop.permute.xlu0 %865 }
 0x192   :  { %v617_v17 = vmul.f32 %v612_v46, %v2890_v61  ;;  %v580_v21 = vsel %vm3780_vm13, %v2805_v26, %v2791_v19  ;;  %v682_v15 = vmul.f32 %v2803_v25, %v2869_v53  ;;  %v740_v26 = vsel %vm3801_vm10, %v2847_v43, %v2811_v29 }
 0x193   :  { %v2363_v1 = vpack.i.bf16 %v522_v28, %v521_v8  ;;  %v585_v35 = vmul.f32 %v580_v21, %v2890_v61  ;;  %vm3796_vm13 = vcmask 310272   ;;  %v804_v25 = vsel %vm3782_vm14, %v2879_v56, %v802_v48 }
 0x194   :  { %v2378_v2 = vpack.i.bf16 %v618_v11, %v617_v17  ;;  %v745_v19 = vmul.f32 %v740_v26, %v2890_v61  ;;  %v650_v43 = vmul.f32 %v2799_v23, %v2869_v53  ;;  %v708_v56 = vsel %vm3797_vm12, %v2835_v38, %v2807_v27 }
 0x195   :  { %2329 = vrot.lane.b32.xlu0 %v2328_v55, %s2599_s21  ;;  %2314 = vrot.lane.b32.xlu1 %v2313_v57, %s2594_s25  ;;  %v644_v55 = vsel %vm3781_vm15, %v2813_v30, %v2799_v23  ;;  %v2388_v57 = vpack.i.bf16 %v682_v15, %v681_v22  ;;  %v2373_v58 = vpack.i.bf16 %v586_v54, %v585_v35  ;;  %vm3795_vm15 = vcmask 408576   ;;  %v150_v35 = vld [vmem:[#allocation3] sm:$0xff] }
 0x196   :  { %v746_v30 = vmul.f32 %v2811_v29, %v2869_v53  ;;  %v649_v12 = vmul.f32 %v644_v55, %v2890_v61  ;;  %v772_v5 = vsel %vm3796_vm13, %v2857_v47, %v2969_v3  ;;  %v809_v29 = vmul.f32 %v804_v25, %v2890_v61 }
 0x197   :  { %v713_v62 = vmul.f32 %v708_v56, %v2890_v61  ;;  %v868_v16 = vsel %vm3795_vm15, %v864_v33, %v866_v59  ;;  %vm3789_vm14 = vcmask 400384   ;;  %v777_v38 = vmul.f32 %v772_v5, %v2890_v61 }
 0x198   :  { %v2398_v23 = vpack.i.bf16 %v746_v30, %v745_v19  ;;  %v778_v47 = vmul.f32 %v2969_v3, %v2869_v53  ;;  %v873_v31 = vmul.f32 %v868_v16, %v2890_v61  ;;  %v874_v10 = vmul.f32 %v866_v59, %v2869_v53  ;;  %v906_v3 = vld [vmem:[%s3725_s4 + $0x8] sm:$0xff] }
 0x199   :  { %2339 = vrot.lane.b32.xlu0 %v2338_v6, %s2601_s19  ;;  %2324 = vrot.lane.b32.xlu1 %v2323_v34, %s2596_s23  ;;  %v810_v6 = vmul.f32 %v802_v48, %v2869_v53  ;;  %v2383_v34 = vpack.i.bf16 %v650_v43, %v649_v12  ;;  %v2393_v9 = vpack.i.bf16 %v714_v37, %v713_v62  ;;  %vm3800_vm15 = vcmask 1022976  }
 0x19a   :  { %v836_v27 = vsel %vm3789_vm14, %v2896_v36, %v834_v51  ;;  %v2403_v20 = vpack.i.bf16 %v778_v47, %v777_v38  ;;  %v2418_v4 = vpack.i.bf16 %v874_v10, %v873_v31  ;;  %vm3794_vm14 = vcmask 588800  }
 0x19b   :  { %v2408_v39 = vpack.i.bf16 %v810_v6, %v809_v29  ;;  %v872_v36 = vmul.f32 %v864_v33, %v2819_v32  ;;  %2148 = vmatprep.mubr.msk.f32.mxu1 %vm3794_vm14, %v906_v3  ;;  %vm3798_vm14 = vcmask 1039360   ;;  %v152_v19 = vmul.f32 %v150_v35, %v2819_v32 }
 0x19c   :  { %vm3799_vm13 = vcmask 1031168   ;;  %vm3805_vm12 = vcmask 1006592   ;;  %vm3809_vm10 = vcmask 900096  }
 0x19d   :  { %2349 = vrot.lane.b32.xlu0 %v2348_v40, %s2603_s17  ;;  %2334 = vrot.lane.b32.xlu1 %v2333_v41, %s2598_s22  ;;  %v841_v40 = vmul.f32 %v836_v27, %v2890_v61  ;;  %v842_v41 = vmul.f32 %v834_v51, %v2869_v53 }
 0x19f   :  { %v2413_v14 = vpack.i.bf16 %v842_v41, %v841_v40 }
 0x1a1   :  { %2359 = vrot.lane.b32.xlu0 %v2358_v42, %s2605_s14  ;;  %2344 = vrot.lane.b32.xlu1 %v2343_v63, %s2600_s20 }
 0x1a5   :  { %2369 = vrot.lane.b32.xlu0 %v2368_v52, %s2607_s12  ;;  %2354 = vrot.lane.b32.xlu1 %v2353_v49, %s2602_s18 }
 0x1a9   :  { %2379 = vrot.lane.b32.xlu0 %v2378_v2, %s3787_s10  ;;  %2364 = vrot.lane.b32.xlu1 %v2363_v1, %s2604_s15  ;;  %v151_v1 = vld [vmem:[#allocation3 + $0x8] sm:$0xff]  ;;  %s3825_s10 = smov 16  }
 0x1ad   :  { %2389 = vrot.lane.b32.xlu0 %v2388_v57, %s3785_s16  ;;  %2374 = vrot.lane.b32.xlu1 %v2373_v58, %s2606_s13  ;;  %v153_v57 = vmul.f32 %v151_v1, %v2890_v61  ;;  %s3821_s16 = smov 3  }
 0x1b1   :  { %2399 = vrot.lane.b32.xlu0 %v2398_v23, %s3783_s29  ;;  %2384 = vrot.lane.b32.xlu1 %v2383_v34, %s2608_s11  ;;  %s2616_s29 = smov 78  }
 0x1b5   :  { %2394 = vrot.lane.b32.xlu1 %v2393_v9, %s2610_s9  ;;  %2409 = vrot.lane.b32.xlu0 %v2408_v39, %s3790_s3  ;;  %s3819_s3 = smov 77  }
 0x1b9   :  { %2404 = vrot.lane.b32.xlu1 %v2403_v20, %s3792_s30  ;;  %2419 = vrot.lane.b32.xlu0 %v2418_v4, %s2616_s29  ;;  %s3822_s30 = smov 4  }
 0x1bd   :  { %2414 = vrot.lane.b32.xlu1 %v2413_v14, %s2614_s28  ;;  %878 = vrot.lane.b32.xlu0 %v872_v36, %s2616_s29 }
 0x1c1   :  { %894 = vrot.lane.b32.xlu1 %v2890_v61, %s3819_s3  ;;  %896 = vrot.lane.b32.xlu0 %v2869_v53, %s3819_s3 }
 0x1c5   :  { %892 = vrot.lane.b32.xlu1 %v2819_v32, %s3819_s3  ;;  %960 = vperm.xlu0 %2307, %v957_v13   ;;  %s3837_s3 = smov 37  }
 0x1d7   :  { %v208_v42 = vpop.permute.xlu1 %207  ;;  %v176_v44 = vpop.permute.xlu0 %175 }
 0x1db   :  { %v272_v63 = vpop.permute.xlu1 %271  ;;  %v240_v7 = vpop.permute.xlu0 %239 }
 0x1df   :  { %v3077_v60 = vpop.permute.xlu1 %334  ;;  %v304_v24 = vpop.permute.xlu0 %303 }
 0x1e3   :  { %v3079_v46 = vpop.permute.xlu1 %398  ;;  %v3081_v48 = vpop.permute.xlu0 %366 }
 0x1e7   :  { %v3083_v53 = vpop.permute.xlu1 %462  ;;  %v3085_v18 = vpop.permute.xlu0 %430 }
 0x1eb   :  { %v3087_v17 = vpop.permute.xlu1 %526  ;;  %v3089_v11 = vpop.permute.xlu0 %494 }
 0x1ef   :  { %v3091_v52 = vpop.permute.xlu1 %590  ;;  %v3093_v49 = vpop.permute.xlu0 %558 }
 0x1f3   :  { %v3095_v8 = vpop.permute.xlu1 %654  ;;  %v3097_v28 = vpop.permute.xlu0 %622 }
 0x1f7   :  { %v3099_v50 = vpop.permute.xlu1 %718  ;;  %v3101_v21 = vpop.permute.xlu0 %686 }
 0x1fb   :  { %v3103_v22 = vpop.permute.xlu1 %782  ;;  %v3105_v15 = vpop.permute.xlu0 %750 }
 0x1ff   :  { %v3107_v51 = vpop.permute.xlu1 %846  ;;  %v3109_v2 = vpop.permute.xlu0 %814 }
 0x203   :  { %v2310_v54 = vpop.permute.xlu1 %2309  ;;  %v2320_v55 = vpop.permute.xlu0 %2319 }
 0x204   :  { %v2312_v26 = vunpack.i.h.bf16 %v2310_v54  ;;  %v2311_v25 = vunpack.i.l.bf16 %v2310_v54  ;;  %v2322_v30 = vunpack.i.h.bf16 %v2320_v55  ;;  %v2321_v12 = vunpack.i.l.bf16 %v2320_v55 }
 0x206   :  { %v182_v58 = vsel %vm3798_vm14, %v176_v44, %v2311_v25  ;;  %v183_v43 = vsel %vm3798_vm14, %v2311_v25, %v2312_v26  ;;  %v246_v32 = vsel %vm3800_vm15, %v240_v7, %v2321_v12  ;;  %v247_v37 = vsel %vm3800_vm15, %v2321_v12, %v2322_v30 }
 0x207   :  { %v2315_v59 = vpop.permute.xlu1 %2314  ;;  %v2330_v56 = vpop.permute.xlu0 %2329  ;;  %v2159_v5 = vpack.c.bf16 %v183_v43, %v153_v57  ;;  %v2161_v29 = vpack.c.bf16 %v182_v58, %v152_v19  ;;  %vm3802_vm14 = vcmask 1014784   ;;  %vm3803_vm15 = vcmask 998400  }
 0x208   :  { %v2317_v6 = vunpack.i.h.bf16 %v2315_v59  ;;  %v2316_v33 = vunpack.i.l.bf16 %v2315_v59  ;;  %v2332_v23 = vunpack.i.h.bf16 %v2330_v56  ;;  %v2331_v34 = vunpack.i.l.bf16 %v2330_v56 }
 0x209   :  { %2160 = vmatprep.subr.bf16.mxu1 %v2159_v5 }
 0x20a   :  { %v214_v61 = vsel %vm3799_vm13, %v208_v42, %v2316_v33  ;;  %2162 = vmatpush1.bf16.msra.mxu1 %v2161_v29  ;;  %v215_v62 = vsel %vm3799_vm13, %v2316_v33, %v2317_v6  ;;  %v310_v39 = vsel %vm3805_vm12, %v304_v24, %v2331_v34  ;;  %v311_v27 = vsel %vm3805_vm12, %v2331_v34, %v2332_v23 }
 0x20b   :  { %v2325_v16 = vpop.permute.xlu1 %2324  ;;  %v2340_v38 = vpop.permute.xlu0 %2339  ;;  %v2163_v47 = vpack.c.bf16 %v247_v37, %v215_v62  ;;  %v2165_v31 = vpack.c.bf16 %v246_v32, %v214_v61  ;;  %vm3804_vm13 = vcmask 916480   ;;  %vm3813_vm12 = vcmask 867328  }
 0x20c   :  { %v2327_v10 = vunpack.i.h.bf16 %v2325_v16  ;;  %v2326_v9 = vunpack.i.l.bf16 %v2325_v16  ;;  %v2342_v41 = vunpack.i.h.bf16 %v2340_v38  ;;  %v2341_v20 = vunpack.i.l.bf16 %v2340_v38 }
 0x20d   :  { %2164 = vmatprep.subr.bf16.mxu1 %v2163_v47 }
 0x20e   :  { %v278_v40 = vsel %vm3802_vm14, %v272_v63, %v2326_v9  ;;  %2166 = vmatpush1.bf16.msra.mxu1 %v2165_v31  ;;  %v279_v4 = vsel %vm3802_vm14, %v2326_v9, %v2327_v10  ;;  %v373_v63 = vsel %vm3804_vm13, %v3081_v48, %v2341_v20  ;;  %v374_v54 = vsel %vm3804_vm13, %v2341_v20, %v2342_v41 }
 0x20f   :  { %v2335_v3 = vpop.permute.xlu1 %2334  ;;  %v2350_v36 = vpop.permute.xlu0 %2349  ;;  %v2167_v14 = vpack.c.bf16 %v311_v27, %v279_v4  ;;  %v2169_v13 = vpack.c.bf16 %v310_v39, %v278_v40  ;;  %vm3806_vm14 = vcmask 908288   ;;  %vm3807_vm13 = vcmask 891904  }
 0x210   :  { %v2337_v42 = vunpack.i.h.bf16 %v2335_v3  ;;  %v2336_v44 = vunpack.i.l.bf16 %v2335_v3  ;;  %v2352_v7 = vunpack.i.h.bf16 %v2350_v36  ;;  %v2351_v24 = vunpack.i.l.bf16 %v2350_v36 }
 0x211   :  { %2168 = vmatprep.subr.bf16.mxu1 %v2167_v14 }
 0x212   :  { %v341_v1 = vsel %vm3803_vm15, %v3077_v60, %v2336_v44  ;;  %2170 = vmatpush1.bf16.msra.mxu1 %v2169_v13  ;;  %v342_v35 = vsel %vm3803_vm15, %v2336_v44, %v2337_v42  ;;  %v437_v30 = vsel %vm3809_vm10, %v3085_v18, %v2351_v24  ;;  %v438_v48 = vsel %vm3809_vm10, %v2351_v24, %v2352_v7 }
 0x213   :  { %v2345_v55 = vpop.permute.xlu1 %2344  ;;  %v2360_v26 = vpop.permute.xlu0 %2359  ;;  %v2171_v25 = vpack.c.bf16 %v374_v54, %v342_v35  ;;  %v2173_v57 = vpack.c.bf16 %v373_v63, %v341_v1  ;;  %vm3808_vm15 = vcmask 883712   ;;  %vm692_vm10 = vcmask 760832  }
 0x214   :  { %v2347_v19 = vunpack.i.h.bf16 %v2345_v55  ;;  %v2346_v58 = vunpack.i.l.bf16 %v2345_v55  ;;  %v2362_v12 = vunpack.i.h.bf16 %v2360_v26  ;;  %v2361_v43 = vunpack.i.l.bf16 %v2360_v26 }
 0x215   :  { %2172 = vmatprep.subr.bf16.mxu1 %v2171_v25 }
 0x216   :  { %v405_v60 = vsel %vm3806_vm14, %v3079_v46, %v2346_v58  ;;  %2174 = vmatpush1.bf16.msra.mxu1 %v2173_v57  ;;  %v406_v59 = vsel %vm3806_vm14, %v2346_v58, %v2347_v19  ;;  %v501_v46 = vsel %vm3808_vm15, %v3089_v11, %v2361_v43  ;;  %v502_v62 = vsel %vm3808_vm15, %v2361_v43, %v2362_v12 }
 0x217   :  { %v2355_v56 = vpop.permute.xlu1 %2354  ;;  %v2370_v5 = vpop.permute.xlu0 %2369  ;;  %v2175_v29 = vpack.c.bf16 %v438_v48, %v406_v59  ;;  %v2177_v6 = vpack.c.bf16 %v437_v30, %v405_v60  ;;  %vm3810_vm14 = vcmask 875520   ;;  %vm3811_vm15 = vcmask 785408  }
 0x218   :  { %v2357_v33 = vunpack.i.h.bf16 %v2355_v56  ;;  %v2356_v23 = vunpack.i.l.bf16 %v2355_v56  ;;  %v2372_v18 = vunpack.i.h.bf16 %v2370_v5  ;;  %v2371_v34 = vunpack.i.l.bf16 %v2370_v5 }
 0x219   :  { %2176 = vmatprep.subr.bf16.mxu1 %v2175_v29 }
 0x21a   :  { %v469_v32 = vsel %vm3807_vm13, %v3083_v53, %v2356_v23  ;;  %2178 = vmatpush1.bf16.msra.mxu1 %v2177_v6  ;;  %v470_v61 = vsel %vm3807_vm13, %v2356_v23, %v2357_v33  ;;  %v565_v9 = vsel %vm3813_vm12, %v3093_v49, %v2371_v34  ;;  %v566_v11 = vsel %vm3813_vm12, %v2371_v34, %v2372_v18 }
 0x21b   :  { %v2365_v37 = vpop.permute.xlu1 %2364  ;;  %v2380_v16 = vpop.permute.xlu0 %2379  ;;  %v2179_v38 = vpack.c.bf16 %v502_v62, %v470_v61  ;;  %v2181_v47 = vpack.c.bf16 %v501_v46, %v469_v32  ;;  %vm3812_vm13 = vcmask 777216   ;;  %vm820_vm12 = vcmask 654336  }
 0x21c   :  { %v2367_v31 = vunpack.i.h.bf16 %v2365_v37  ;;  %v2366_v10 = vunpack.i.l.bf16 %v2365_v37  ;;  %v2382_v39 = vunpack.i.h.bf16 %v2380_v16  ;;  %v2381_v27 = vunpack.i.l.bf16 %v2380_v16 }
 0x21d   :  { %2180 = vmatprep.subr.bf16.mxu1 %v2179_v38 }
 0x21e   :  { %v533_v53 = vsel %vm3810_vm14, %v3087_v17, %v2366_v10  ;;  %2182 = vmatpush1.bf16.msra.mxu1 %v2181_v47  ;;  %v534_v40 = vsel %vm3810_vm14, %v2366_v10, %v2367_v31  ;;  %v629_v17 = vsel %vm3812_vm13, %v3097_v28, %v2381_v27  ;;  %v630_v7 = vsel %vm3812_vm13, %v2381_v27, %v2382_v39 }
 0x21f   :  { %v2375_v41 = vpop.permute.xlu1 %2374  ;;  %v2390_v20 = vpop.permute.xlu0 %2389  ;;  %v2183_v4 = vpack.c.bf16 %v566_v11, %v534_v40  ;;  %v2185_v3 = vpack.c.bf16 %v565_v9, %v533_v53  ;;  %vm3814_vm14 = vcmask 769024   ;;  %vm3815_vm13 = vcmask 752640  }
 0x220   :  { %v2377_v36 = vunpack.i.h.bf16 %v2375_v41  ;;  %v2376_v14 = vunpack.i.l.bf16 %v2375_v41  ;;  %v2392_v49 = vunpack.i.h.bf16 %v2390_v20  ;;  %v2391_v13 = vunpack.i.l.bf16 %v2390_v20 }
 0x221   :  { %2184 = vmatprep.subr.bf16.mxu1 %v2183_v4 }
 0x222   :  { %v597_v42 = vsel %vm3811_vm15, %v3091_v52, %v2376_v14  ;;  %2186 = vmatpush1.bf16.msra.mxu1 %v2185_v3  ;;  %v598_v44 = vsel %vm3811_vm15, %v2376_v14, %v2377_v36  ;;  %v693_v26 = vsel %vm692_vm10, %v3101_v21, %v2391_v13  ;;  %v694_v28 = vsel %vm692_vm10, %v2391_v13, %v2392_v49  ;;  %v905_v3 = vld [vmem:[%s3725_s4] sm:$0xff]  ;;  %v1225_v36 = vld [vmem:[#allocation3 + $0x10] sm:$0xff]  ;;  %v1226_v14 = vld [vmem:[#allocation3 + $0x18] sm:$0xff] }
 0x223   :  { %v2385_v24 = vpop.permute.xlu1 %2384  ;;  %v2400_v63 = vpop.permute.xlu0 %2399  ;;  %v2187_v1 = vpack.c.bf16 %v630_v7, %v598_v44  ;;  %v2189_v35 = vpack.c.bf16 %v629_v17, %v597_v42  ;;  %vm3816_vm15 = vcmask 744448   ;;  %1229 = vrot.lane.b32.xlu1 %v1225_v36, %s2571_s26  ;;  %1231 = vrot.lane.b32.xlu0 %v1226_v14, %s2571_s26  ;;  %v1255_v49 = vld [vmem:[#allocation3 + $0x20] sm:$0xff]  ;;  %v1256_v13 = vld [vmem:[#allocation3 + $0x28] sm:$0xff]  ;;  %v1285_v17 = vld [vmem:[#allocation3 + $0x30] sm:$0xff]  ;;  %s3823_s26 = smov 5  }
 0x224   :  { %v2387_v54 = vunpack.i.h.bf16 %v2385_v24  ;;  %v2386_v55 = vunpack.i.l.bf16 %v2385_v24  ;;  %v2402_v25 = vunpack.i.h.bf16 %v2400_v63  ;;  %v2401_v57 = vunpack.i.l.bf16 %v2400_v63  ;;  %v1286_v42 = vld [vmem:[#allocation3 + $0x38] sm:$0xff]  ;;  %v1315_v44 = vld [vmem:[#allocation3 + $0x40] sm:$0xff]  ;;  %v1316_v7 = vld [vmem:[#allocation3 + $0x48] sm:$0xff] }
 0x225   :  { %2188 = vmatprep.subr.bf16.mxu1 %v2187_v1  ;;  %v1345_v24 = vld [vmem:[#allocation3 + $0x50] sm:$0xff]  ;;  %v1346_v63 = vld [vmem:[#allocation3 + $0x58] sm:$0xff]  ;;  %v1375_v1 = vld [vmem:[#allocation3 + $0x60] sm:$0xff] }
 0x226   :  { %v661_v52 = vsel %vm3814_vm14, %v3095_v8, %v2386_v55  ;;  %2190 = vmatpush1.bf16.msra.mxu1 %v2189_v35  ;;  %v662_v19 = vsel %vm3814_vm14, %v2386_v55, %v2387_v54  ;;  %v757_v8 = vsel %vm3816_vm15, %v3105_v15, %v2401_v57  ;;  %v758_v29 = vsel %vm3816_vm15, %v2401_v57, %v2402_v25  ;;  %v1376_v35 = vld [vmem:[#allocation3 + $0x68] sm:$0xff]  ;;  %v1405_v54 = vld [vmem:[#allocation3 + $0x70] sm:$0xff]  ;;  %v1406_v55 = vld [vmem:[#allocation3 + $0x78] sm:$0xff] }
 0x227   :  { %v2395_v58 = vpop.permute.xlu1 %2394  ;;  %v2410_v30 = vpop.permute.xlu0 %2409  ;;  %v2191_v48 = vpack.c.bf16 %v694_v28, %v662_v19  ;;  %v2193_v60 = vpack.c.bf16 %v693_v26, %v661_v52  ;;  %vm3817_vm14 = vcmask 736256   ;;  %vm884_vm15 = vcmask 637952   ;;  %1259 = vrot.lane.b32.xlu1 %v1255_v49, %s2572_s27  ;;  %1261 = vrot.lane.b32.xlu0 %v1256_v13, %s2572_s27  ;;  %s3824_s27 = smov 6   ;;  %v1435_v26 = vld [vmem:[#allocation3 + $0x80] sm:$0xff]  ;;  %v1436_v28 = vld [vmem:[#allocation3 + $0x88] sm:$0xff]  ;;  %v1465_v52 = vld [vmem:[#allocation3 + $0x90] sm:$0xff] }
 0x228   :  { %v2397_v12 = vunpack.i.h.bf16 %v2395_v58  ;;  %v2396_v43 = vunpack.i.l.bf16 %v2395_v58  ;;  %v2412_v21 = vunpack.i.h.bf16 %v2410_v30  ;;  %v2411_v59 = vunpack.i.l.bf16 %v2410_v30  ;;  %v1466_v25 = vld [vmem:[#allocation3 + $0x98] sm:$0xff]  ;;  %v1495_v57 = vld [vmem:[#allocation3 + $0xa0] sm:$0xff]  ;;  %v1496_v19 = vld [vmem:[#allocation3 + $0xa8] sm:$0xff] }
 0x229   :  { %2192 = vmatprep.subr.bf16.mxu1 %v2191_v48  ;;  %v1525_v58 = vld [vmem:[#allocation3 + $0xb0] sm:$0xff]  ;;  %v1526_v30 = vld [vmem:[#allocation3 + $0xb8] sm:$0xff]  ;;  %v1555_v48 = vld [vmem:[#allocation3 + $0xc0] sm:$0xff] }
 0x22a   :  { %v725_v56 = vsel %vm3815_vm13, %v3099_v50, %v2396_v43  ;;  %2194 = vmatpush1.bf16.msra.mxu1 %v2193_v60  ;;  %v726_v5 = vsel %vm3815_vm13, %v2396_v43, %v2397_v12  ;;  %v821_v32 = vsel %vm820_vm12, %v3109_v2, %v2411_v59  ;;  %v822_v15 = vsel %vm820_vm12, %v2411_v59, %v2412_v21  ;;  %v1556_v60 = vld [vmem:[#allocation3 + $0xc8] sm:$0xff]  ;;  %v1585_v12 = vld [vmem:[#allocation3 + $0xd0] sm:$0xff]  ;;  %v1586_v43 = vld [vmem:[#allocation3 + $0xd8] sm:$0xff] }
 0x22b   :  { %v2405_v6 = vpop.permute.xlu1 %2404  ;;  %v2420_v33 = vpop.permute.xlu0 %2419  ;;  %v2195_v23 = vpack.c.bf16 %v758_v29, %v726_v5  ;;  %v2197_v18 = vpack.c.bf16 %v757_v8, %v725_v56  ;;  %vm852_vm13 = vcmask 646144   ;;  %1289 = vrot.lane.b32.xlu1 %v1285_v17, %s3821_s16  ;;  %1291 = vrot.lane.b32.xlu0 %v1286_v42, %s3821_s16  ;;  %s3826_s16 = smov 17   ;;  %v1615_v21 = vld [vmem:[#allocation3 + $0xe0] sm:$0xff]  ;;  %v1616_v59 = vld [vmem:[#allocation3 + $0xe8] sm:$0xff]  ;;  %v1645_v8 = vld [vmem:[#allocation3 + $0xf0] sm:$0xff] }
 0x22c   :  { %v2407_v34 = vunpack.i.h.bf16 %v2405_v6  ;;  %v2406_v46 = vunpack.i.l.bf16 %v2405_v6  ;;  %v2422_v61 = vunpack.i.h.bf16 %v2420_v33  ;;  %v2421_v62 = vunpack.i.l.bf16 %v2420_v33  ;;  %v1646_v56 = vld [vmem:[#allocation3 + $0xf8] sm:$0xff]  ;;  %v1675_v5 = vld [vmem:[#allocation3 + $0x100] sm:$0xff]  ;;  %v1676_v29 = vld [vmem:[#allocation3 + $0x108] sm:$0xff] }
 0x22d   :  { %2196 = vmatprep.subr.bf16.mxu1 %v2195_v23  ;;  %v1705_v6 = vld [vmem:[#allocation3 + $0x110] sm:$0xff]  ;;  %v1706_v33 = vld [vmem:[#allocation3 + $0x118] sm:$0xff]  ;;  %v1735_v23 = vld [vmem:[#allocation3 + $0x120] sm:$0xff] }
 0x22e   :  { %v789_v50 = vsel %vm3817_vm14, %v3103_v22, %v2406_v46  ;;  %2198 = vmatpush1.bf16.msra.mxu1 %v2197_v18  ;;  %v790_v37 = vsel %vm3817_vm14, %v2406_v46, %v2407_v34  ;;  %v886_v53 = vsel %vm884_vm15, %v2421_v62, %v2422_v61  ;;  %vm3818_vm14 = vcmask 629760   ;;  %v1736_v18 = vld [vmem:[#allocation3 + $0x128] sm:$0xff]  ;;  %v1826_v36 = vld [vmem:[#allocation3 + $0x158] sm:$0xff] }
 0x22f   :  { %v2415_v16 = vpop.permute.xlu1 %2414  ;;  %v879_v38 = vpop.permute.xlu0 %878  ;;  %v2199_v47 = vpack.c.bf16 %v822_v15, %v790_v37  ;;  %v2201_v31 = vpack.c.bf16 %v821_v32, %v789_v50  ;;  %1319 = vrot.lane.b32.xlu1 %v1315_v44, %s3822_s30  ;;  %1321 = vrot.lane.b32.xlu0 %v1316_v7, %s3822_s30  ;;  %s3827_s30 = smov 18   ;;  %v3221_v37 = vld [vmem:[%s3727_s6] sm:$0x3f]  ;;  %v1856_v49 = vld [vmem:[#allocation3 + $0x168] sm:$0xff]  ;;  %v1886_v17 = vld [vmem:[#allocation3 + $0x178] sm:$0xff]  ;;  %s3843_s6 = smov 95  }
 0x230   :  { %v2417_v10 = vunpack.i.h.bf16 %v2415_v16  ;;  %v2416_v9 = vunpack.i.l.bf16 %v2415_v16  ;;  %v885_v11 = vsel %vm884_vm15, %v879_v38, %v2421_v62  ;;  %v3226_v16 = vld [vmem:[%s3721_s0 + $0x18] sm:$0x3f]  ;;  %v3231_v38 = vld [vmem:[%s3721_s0 + $0x10] sm:$0x3f] }
 0x231   :  { %2200 = vmatprep.subr.bf16.mxu1 %v2199_v47  ;;  %v2539_v47 = vld [vmem:[%s3723_s2] sm:$0xff]  ;;  %s3839_s2 = smov 51  }
 0x232   :  { %v853_v2 = vsel %vm852_vm13, %v3107_v51, %v2416_v9  ;;  %2202 = vmatpush1.bf16.msra.mxu1 %v2201_v31  ;;  %v854_v22 = vsel %vm852_vm13, %v2416_v9, %v2417_v10  ;;  %v1765_v31 = vld [vmem:[#allocation3 + $0x130] sm:$0xff]  ;;  %v1766_v10 = vld [vmem:[#allocation3 + $0x138] sm:$0xff]  ;;  %v1795_v9 = vld [vmem:[#allocation3 + $0x140] sm:$0xff] }
 0x233   :  { %v2205_v39 = vpack.c.bf16 %v885_v11, %v853_v2  ;;  %v895_v27 = vpop.permute.xlu1 %894  ;;  %v897_v40 = vpop.permute.xlu0 %896  ;;  %v2203_v41 = vpack.c.bf16 %v886_v53, %v854_v22  ;;  %1349 = vrot.lane.b32.xlu1 %v1345_v24, %s3823_s26  ;;  %1351 = vrot.lane.b32.xlu0 %v1346_v63, %s3823_s26  ;;  %s3828_s26 = smov 19  }
 0x234   :  { %v900_v20 = vsel %vm3818_vm14, %v895_v27, %v897_v40 }
 0x235   :  { %2204 = vmatprep.subr.bf16.mxu1 %v2203_v41 }
 0x236   :  { %2206 = vmatpush1.bf16.msra.mxu1 %v2205_v39 }
 0x237   :  { %v893_v4 = vpop.permute.xlu1 %892  ;;  %1015 = vmatprep.subr.mxu1 %v900_v20  ;;  %1379 = vrot.lane.b32.xlu1 %v1375_v1, %s3824_s27 }
 0x238   :  { %v899_v51 = vsel %vm3818_vm14, %v893_v4, %v895_v27  ;;  %1381 = vrot.lane.b32.xlu0 %v1376_v35, %s3824_s27  ;;  %s3829_s27 = smov 20   ;;  %vm1045_vm14 = vcmask 64512   ;;  %v1825_v4 = vld [vmem:[#allocation3 + $0x150] sm:$0xff] }
 0x23a   :  { %1016 = vmatpush1.msra.mxu1 %v899_v51  ;;  %v1796_v51 = vld [vmem:[#allocation3 + $0x148] sm:$0xff] }
 0x23b   :  { %1032 = vmatmul.mubr.f32.vlgmr.msra.gmra.mrb[2].mxu1 %v905_v3  ;;  %1409 = vrot.lane.b32.xlu1 %v1405_v54, %s3825_s10  ;;  %v1855_v3 = vld [vmem:[#allocation3 + $0x160] sm:$0xff] }
 0x23c   :  { %2126 = vmatprep.mubr.f32.mxu1 %v2569_v0  ;;  %1411 = vrot.lane.b32.xlu0 %v1406_v55, %s3825_s10  ;;  %s3830_s10 = smov 21  }
 0x23f   :  { %1439 = vrot.lane.b32.xlu1 %v1435_v26, %s3826_s16 }
 0x240   :  { %1441 = vrot.lane.b32.xlu0 %v1436_v28, %s3826_s16  ;;  %s3831_s16 = smov 22  }
 0x243   :  { %1469 = vrot.lane.b32.xlu1 %v1465_v52, %s3827_s30 }
 0x244   :  { %1471 = vrot.lane.b32.xlu0 %v1466_v25, %s3827_s30  ;;  %s3832_s30 = smov 32   ;;  %v961_v34 = vpop.permute.xlu0 %960 }
 0x247   :  { %1499 = vrot.lane.b32.xlu1 %v1495_v57, %s3828_s26 }
 0x248   :  { %1501 = vrot.lane.b32.xlu0 %v1496_v19, %s3828_s26  ;;  %s3833_s26 = smov 33  }
 0x24b   :  { %1529 = vrot.lane.b32.xlu1 %v1525_v58, %s3829_s27 }
 0x24c   :  { %1531 = vrot.lane.b32.xlu0 %v1526_v30, %s3829_s27  ;;  %s3834_s27 = smov 34  }
 0x24f   :  { %1559 = vrot.lane.b32.xlu1 %v1555_v48, %s3830_s10 }
 0x250   :  { %1561 = vrot.lane.b32.xlu0 %v1556_v60, %s3830_s10  ;;  %s3835_s10 = smov 35  }
 0x253   :  { %1589 = vrot.lane.b32.xlu1 %v1585_v12, %s3831_s16 }
 0x254   :  { %1591 = vrot.lane.b32.xlu0 %v1586_v43, %s3831_s16  ;;  %s3836_s16 = smov 36  }
 0x257   :  { %1619 = vrot.lane.b32.xlu1 %v1615_v21, %s3832_s30 }
 0x258   :  { %1621 = vrot.lane.b32.xlu0 %v1616_v59, %s3832_s30  ;;  %s3844_s30 = smov 93  }
 0x25b   :  { %1649 = vrot.lane.b32.xlu1 %v1645_v8, %s3833_s26 }
 0x25c   :  { %1651 = vrot.lane.b32.xlu0 %v1646_v56, %s3833_s26  ;;  %s3838_s26 = smov 38  }
 0x25f   :  { %1679 = vrot.lane.b32.xlu1 %v1675_v5, %s3834_s27 }
 0x260   :  { %1681 = vrot.lane.b32.xlu0 %v1676_v29, %s3834_s27  ;;  %s3840_s27 = smov 48  }
 0x263   :  { %1709 = vrot.lane.b32.xlu1 %v1705_v6, %s3835_s10 }
 0x264   :  { %1711 = vrot.lane.b32.xlu0 %v1706_v33, %s3835_s10  ;;  %s3841_s10 = smov 49  }
 0x267   :  { %1739 = vrot.lane.b32.xlu1 %v1735_v23, %s3836_s16 }
 0x268   :  { %1741 = vrot.lane.b32.xlu0 %v1736_v18, %s3836_s16  ;;  %s3842_s16 = smov 50  }
 0x26b   :  { %1769 = vrot.lane.b32.xlu1 %v1765_v31, %s3837_s3 }
 0x26c   :  { %1771 = vrot.lane.b32.xlu0 %v1766_v10, %s3837_s3  ;;  %s3845_s3 = smov 90  }
 0x26f   :  { %1799 = vrot.lane.b32.xlu1 %v1795_v9, %s3838_s26 }
 0x295   :  { %v3278_v63 = vpop.permute.xlu0 %1231 }
 0x299   :  { %v3282_v35 = vpop.permute.xlu0 %1261 }
 0x29d   :  { %v3286_v55 = vpop.permute.xlu0 %1291 }
 0x2a1   :  { %v3290_v28 = vpop.permute.xlu0 %1321 }
 0x2a5   :  { %v3294_v25 = vpop.permute.xlu0 %1351 }
 0x2aa   :  { %v3298_v19 = vpop.permute.xlu0 %1381 }
 0x2ae   :  { %v3302_v30 = vpop.permute.xlu0 %1411 }
 0x2b2   :  { %v3306_v60 = vpop.permute.xlu0 %1441 }
 0x2b6   :  { %v3310_v43 = vpop.permute.xlu0 %1471 }
 0x2ba   :  { %v3314_v59 = vpop.permute.xlu0 %1501 }
 0x2be   :  { %v3318_v56 = vpop.permute.xlu0 %1531 }
 0x2c2   :  { %v3322_v29 = vpop.permute.xlu0 %1561 }
 0x2c6   :  { %v3326_v33 = vpop.permute.xlu0 %1591 }
 0x2ca   :  { %v3328_v18 = vpop.permute.xlu0 %1621 }
 0x30e   :  { %v1033_v46 = vpop.f32.mrb[2].mxu1 }
 0x30f   :  { %v1034_v32 = vadd.f32 %v1033_v46, %v961_v34  ;;  %v1035_v15 = vpop.f32.mrb[3].mxu1 }
 0x310   :  { %v1036_v50 = vadd.f32 %v1035_v15, %v961_v34 }
 0x311   :  { %v1038_v62 = vmax.f32 %v1034_v32, 0.0 }
 0x312   :  { %v1039_v61 = vmax.f32 %v1036_v50, 0.0 }
 0x314   :  { %1049 = vmatprep.subr.mxu0 %v1039_v61  ;;  %v3343_v61 = vpop.permute.xlu0 %1651 }
 0x315   :  { %1050 = vmatpush1.msra.mxu0 %v1038_v62 }
 0x316   :  { %2149 = vmatmul.mubr.msk.f32.vlgmr.msra.gmra.mrb[0].mxu0 %vm1045_vm14, %v3221_v37  ;;  %2152 = vmatprep.subr.msk.mxu0 %vm58_vm0, %v3226_v16 }
 0x317   :  { %2153 = vmatpush1.msk.msra.mxu0 %vm58_vm0, %v3231_v38  ;;  %1199 = vmatprep.mubr.f32.mxu0 %v2569_v0  ;;  %v3251_v0 = vpop.permute.xlu1 %1229  ;;  %vm3848_vm0 = vcmask 138240  }
 0x318   :  { %v3353_v31 = vpop.permute.xlu0 %1681 }
 0x31a   :  { %2154 = vmatmul.mubr.msk.f32.vlgmr.msra.gmra.mrb[2].mxu0 %vm54_vm1, %v2539_v47 }
 0x31b   :  { %v3256_v20 = vpop.permute.xlu1 %1259 }
 0x31f   :  { %v3261_v14 = vpop.permute.xlu1 %1289 }
 0x323   :  { %v3266_v13 = vpop.permute.xlu1 %1319 }
 0x327   :  { %v3270_v42 = vpop.permute.xlu1 %1349 }
 0x32b   :  { %v3272_v44 = vpop.permute.xlu1 %1379 }
 0x32f   :  { %v3274_v7 = vpop.permute.xlu1 %1409 }
 0x333   :  { %v3276_v24 = vpop.permute.xlu1 %1439 }
 0x337   :  { %v3280_v1 = vpop.permute.xlu1 %1469 }
 0x33b   :  { %v3284_v54 = vpop.permute.xlu1 %1499 }
 0x33f   :  { %v3288_v26 = vpop.permute.xlu1 %1529 }
 0x343   :  { %v3292_v52 = vpop.permute.xlu1 %1559 }
 0x347   :  { %v3296_v57 = vpop.permute.xlu1 %1589 }
 0x34b   :  { %v3300_v58 = vpop.permute.xlu1 %1619 }
 0x34f   :  { %v3304_v48 = vpop.permute.xlu1 %1649 }
 0x353   :  { %v3308_v12 = vpop.permute.xlu1 %1679 }
 0x357   :  { %v3312_v21 = vpop.permute.xlu1 %1709 }
 0x35b   :  { %v3316_v8 = vpop.permute.xlu1 %1739 }
 0x35f   :  { %v3320_v5 = vpop.permute.xlu1 %1769 }
 0x363   :  { %v3324_v6 = vpop.permute.xlu1 %1799 }
 0x3e9   :  { %v3247_v2 = vpop.f32.mrb[0].mxu0 }
 0x3ea   :  { %v3249_v11 = vpop.f32.mrb[1].mxu0 }
 0x3ed   :  { %v1201_v22 = vpop.f32.mrb[2].mxu0 }
 0x3ee   :  { %v1202_v53 = vadd.f32 %v1201_v22, %v2732_v45  ;;  %v1203_v39 = vpop.f32.mrb[3].mxu0 }
 0x3ef   :  { %v1204_v27 = vadd.f32 %v1203_v39, %v2732_v45  ;;  %v1885_v45 = vld [vmem:[#allocation3 + $0x170] sm:$0xff]  ;;  %v3365_v39 = vpop.permute.xlu0 %1711 }
 0x3f0   :  { %v1206_v40 = vmax.f32 %v1202_v53, 0.0 }
 0x3f1   :  { %v1207_v41 = vmax.f32 %v1204_v27, 0.0 }
 0x3f2   :  { %1210 = vrot.lane.b32.xlu1 %v1206_v40, %s3839_s2 }
 0x3f3   :  { %1212 = vrot.lane.b32.xlu0 %v1207_v41, %s3839_s2  ;;  %v3375_v41 = vpop.permute.xlu0 %1741  ;;  %s3847_s2 = smov 80  }
 0x3f6   :  { %1829 = vrot.lane.b32.xlu1 %v1825_v4, %s3840_s27 }
 0x3f7   :  { %1801 = vrot.lane.b32.xlu0 %v1796_v51, %s3838_s26  ;;  %s3846_s26 = smov 91  }
 0x3fa   :  { %1859 = vrot.lane.b32.xlu1 %v1855_v3, %s3841_s10 }
 0x3fb   :  { %1831 = vrot.lane.b32.xlu0 %v1826_v36, %s3840_s27 }
 0x3fe   :  { %1889 = vrot.lane.b32.xlu1 %v1885_v45, %s3842_s16  ;;  %v3387_v45 = vpop.permute.xlu0 %1771 }
 0x3ff   :  { %1861 = vrot.lane.b32.xlu0 %v1856_v49, %s3841_s10 }
 0x403   :  { %1891 = vrot.lane.b32.xlu0 %v1886_v17, %s3842_s16 }
 0x464   :  { %v1211_v23 = vpop.permute.xlu1 %1210 }
 0x465   :  { %v3331_v34 = vsel %vm144_vm2, 0.0, %v1211_v23 }
 0x466   :  { %v1267_v46 = vmul.f32 %v3256_v20, %v3331_v34  ;;  %v1237_v32 = vmul.f32 %v3251_v0, %v3331_v34  ;;  %v1327_v15 = vmul.f32 %v3266_v13, %v3331_v34  ;;  %v1297_v50 = vmul.f32 %v3261_v14, %v3331_v34 }
 0x467   :  { %v1387_v62 = vmul.f32 %v3272_v44, %v3331_v34  ;;  %v1357_v47 = vmul.f32 %v3270_v42, %v3331_v34  ;;  %v1447_v10 = vmul.f32 %v3276_v24, %v3331_v34  ;;  %v1417_v9 = vmul.f32 %v3274_v7, %v3331_v34 }
 0x468   :  { %1273 = vrot.lane.b32.xlu1 %v1267_v46, %s2594_s25  ;;  %1243 = vrot.lane.b32.xlu0 %v1237_v32, %s2595_s24  ;;  %v1507_v22 = vmul.f32 %v3284_v54, %v3331_v34  ;;  %v1477_v53 = vmul.f32 %v3280_v1, %v3331_v34  ;;  %v1567_v27 = vmul.f32 %v3292_v52, %v3331_v34  ;;  %v3391_v49 = vpop.permute.xlu1 %1829  ;;  %v3397_v32 = vpop.permute.xlu0 %1212 }
 0x469   :  { %v1537_v40 = vmul.f32 %v3288_v26, %v3331_v34  ;;  %v1627_v4 = vmul.f32 %v3300_v58, %v3331_v34  ;;  %v1597_v51 = vmul.f32 %v3296_v57, %v3331_v34  ;;  %v1687_v3 = vmul.f32 %v3308_v12, %v3331_v34 }
 0x46a   :  { %v1657_v36 = vmul.f32 %v3304_v48, %v3331_v34  ;;  %v1747_v17 = vmul.f32 %v3316_v8, %v3331_v34  ;;  %v1717_v46 = vmul.f32 %v3312_v21, %v3331_v34 }
 0x46c   :  { %1333 = vrot.lane.b32.xlu1 %v1327_v15, %s2596_s23  ;;  %1303 = vrot.lane.b32.xlu0 %v1297_v50, %s2597_s1  ;;  %v3403_v15 = vsel %vm144_vm2, %v1211_v23, %v3397_v32  ;;  %v1807_v50 = vmul.f32 %v3324_v6, %v3331_v34  ;;  %v1233_v23 = vsel %vm164_vm4, %v3251_v0, %v3278_v63  ;;  %vm3850_vm2 = vcmask 154624  }
 0x46d   :  { %v1353_v0 = vsel %vm292_vm6, %v3270_v42, %v3294_v25  ;;  %v1269_v42 = vmul.f32 %v3282_v35, %v3397_v32  ;;  %vm3852_vm4 = vcmask 171008   ;;  %vm3854_vm6 = vcmask 261120  }
 0x470   :  { %1393 = vrot.lane.b32.xlu1 %v1387_v62, %s2598_s22  ;;  %1363 = vrot.lane.b32.xlu0 %v1357_v47, %s2599_s21  ;;  %v1777_v62 = vmul.f32 %v3320_v5, %v3331_v34  ;;  %v3409_v47 = vpop.permute.xlu1 %1859 }
 0x474   :  { %1453 = vrot.lane.b32.xlu1 %v1447_v10, %s2600_s20  ;;  %1423 = vrot.lane.b32.xlu0 %v1417_v9, %s2601_s19  ;;  %v1293_v10 = vsel %vm228_vm3, %v3261_v14, %v3286_v55  ;;  %v1238_v14 = vmul.f32 %v1233_v23, %v3403_v15  ;;  %vm3851_vm3 = vcmask 269312  }
 0x475   :  { %v1298_v9 = vmul.f32 %v1293_v10, %v3403_v15  ;;  %v1473_v10 = vsel %vm419_vm9, %v3280_v1, %v3310_v43  ;;  %v1389_v1 = vmul.f32 %v3298_v19, %v3397_v32  ;;  %vm3857_vm9 = vcmask 392192  }
 0x476   :  { %v1478_v23 = vmul.f32 %v1473_v10, %v3403_v15 }
 0x478   :  { %1513 = vrot.lane.b32.xlu1 %v1507_v22, %s2602_s18  ;;  %1483 = vrot.lane.b32.xlu0 %v1477_v53, %s2603_s17  ;;  %v1299_v22 = vmul.f32 %v3286_v55, %v3397_v32  ;;  %v1837_v53 = vmul.f32 %v3391_v49, %v3331_v34  ;;  %v1263_v55 = vsel %vm196_vm5, %v3256_v20, %v3282_v35  ;;  %vm3853_vm5 = vcmask 285696  }
 0x479   :  { %v1323_v20 = vsel %vm260_vm7, %v3266_v13, %v3290_v28  ;;  %v1383_v13 = vsel %vm54_vm1, %v3272_v44, %v3298_v19  ;;  %v1443_v44 = vsel %vm3848_vm0, %v3276_v24, %v3306_v60  ;;  %vm3849_vm1 = vcmask 179200  }
 0x47a   :  { %v1328_v35 = vmul.f32 %v1323_v20, %v3403_v15  ;;  %v1503_v24 = vsel %vm3850_vm2, %v3284_v54, %v3314_v59  ;;  %v1563_v54 = vsel %vm3852_vm4, %v3292_v52, %v3322_v29  ;;  %v1623_v52 = vsel %vm3854_vm6, %v3300_v58, %v3328_v18 }
 0x47b   :  { %v1568_v20 = vmul.f32 %v1563_v54, %v3403_v15  ;;  %vm3855_vm7 = vcmask 302080   ;;  %vm3859_vm0 = vcmask 310272   ;;  %vm3861_vm2 = vcmask 400384  }
 0x47c   :  { %1573 = vrot.lane.b32.xlu1 %v1567_v27, %s2604_s15  ;;  %1543 = vrot.lane.b32.xlu0 %v1537_v40, %s2605_s14  ;;  %v1867_v27 = vmul.f32 %v3409_v47, %v3331_v34  ;;  %v1239_v40 = vmul.f32 %v3278_v63, %v3397_v32  ;;  %v1268_v63 = vmul.f32 %v1263_v55, %v3403_v15  ;;  %vm3864_vm4 = vcmask 1039360  }
 0x47d   :  { %v1593_v55 = vsel %vm3849_vm1, %v3296_v57, %v3326_v33  ;;  %v1509_v57 = vmul.f32 %v3314_v59, %v3397_v32  ;;  %v1659_v59 = vmul.f32 %v3343_v61, %v3397_v32  ;;  %vm3860_vm1 = vcmask 408576  }
 0x47e   :  { %vm3866_vm6 = vcmask 1022976  }
 0x480   :  { %1633 = vrot.lane.b32.xlu1 %v1627_v4, %s2606_s13  ;;  %1603 = vrot.lane.b32.xlu0 %v1597_v51, %s2607_s12  ;;  %v2433_v4 = vpack.i.bf16 %v1299_v22, %v1298_v9  ;;  %v1358_v51 = vmul.f32 %v1353_v0, %v3403_v15  ;;  %v1479_v22 = vmul.f32 %v3310_v43, %v3397_v32 }
 0x481   :  { %v1539_v43 = vmul.f32 %v3318_v56, %v3397_v32  ;;  %v1448_v0 = vmul.f32 %v1443_v44, %v3403_v15  ;;  %v1749_v44 = vmul.f32 %v3375_v41, %v3397_v32 }
 0x482   :  { %v2463_v19 = vpack.i.bf16 %v1479_v22, %v1478_v23  ;;  %v1689_v23 = vmul.f32 %v3353_v31, %v3397_v32 }
 0x484   :  { %1693 = vrot.lane.b32.xlu1 %v1687_v3, %s2608_s11  ;;  %1663 = vrot.lane.b32.xlu0 %v1657_v36, %s3843_s6  ;;  %v2423_v3 = vpack.i.bf16 %v1239_v40, %v1238_v14  ;;  %v1359_v36 = vmul.f32 %v3294_v25, %v3397_v32  ;;  %v1419_v25 = vmul.f32 %v3302_v30, %v3397_v32  ;;  %v3482_v14 = vpop.permute.xlu0 %1801 }
 0x488   :  { %1753 = vrot.lane.b32.xlu1 %v1747_v17, %s2610_s9  ;;  %1723 = vrot.lane.b32.xlu0 %v1717_v46, %s3844_s30  ;;  %v1413_v17 = vsel %vm355_vm8, %v3274_v7, %v3302_v30  ;;  %v1329_v7 = vmul.f32 %v3290_v28, %v3397_v32  ;;  %v1388_v28 = vmul.f32 %v1383_v13, %v3403_v15  ;;  %vm3856_vm8 = vcmask 277504  }
 0x489   :  { %v1418_v46 = vmul.f32 %v1413_v17, %v3403_v15  ;;  %v1683_v58 = vsel %vm3856_vm8, %v3308_v12, %v3353_v31 }
 0x48a   :  { %v2438_v9 = vpack.i.bf16 %v1329_v7, %v1328_v35  ;;  %v2448_v40 = vpack.i.bf16 %v1389_v1, %v1388_v28  ;;  %v1628_v35 = vmul.f32 %v1623_v52, %v3403_v15  ;;  %v1773_v7 = vsel %vm3855_vm7, %v3320_v5, %v3387_v45  ;;  %v1890_v28 = vpop.permute.xlu1 %1889 }
 0x48b   :  { %v2453_v30 = vpack.i.bf16 %v1419_v25, %v1418_v46  ;;  %v1713_v46 = vsel %vm3853_vm5, %v3312_v21, %v3365_v39  ;;  %v1629_v21 = vmul.f32 %v3328_v18, %v3397_v32  ;;  %v1778_v13 = vmul.f32 %v1773_v7, %v3403_v15  ;;  %vm3865_vm5 = vmmov %vm3864_vm4 }
 0x48c   :  { %1813 = vrot.lane.b32.xlu1 %v1807_v50, %s3845_s3  ;;  %1783 = vrot.lane.b32.xlu0 %v1777_v62, %s3846_s26  ;;  %v2443_v50 = vpack.i.bf16 %v1359_v36, %v1358_v51  ;;  %v2428_v62 = vpack.i.bf16 %v1269_v42, %v1268_v63  ;;  %v1653_v36 = vsel %vm3851_vm3, %v3304_v48, %v3343_v61  ;;  %v1832_v63 = vpop.permute.xlu0 %1831  ;;  %vm3862_vm3 = vcmask 588800  }
 0x48d   :  { %v1658_v42 = vmul.f32 %v1653_v36, %v3403_v15  ;;  %v1569_v48 = vmul.f32 %v3322_v29, %v3397_v32  ;;  %v1718_v25 = vmul.f32 %v1713_v46, %v3403_v15  ;;  %v1719_v61 = vmul.f32 %v3365_v39, %v3397_v32 }
 0x48e   :  { %v1833_v39 = vsel %vm3857_vm9, %v3391_v49, %v1832_v63  ;;  %v1779_v18 = vmul.f32 %v3387_v45, %v3397_v32  ;;  %v1688_v5 = vmul.f32 %v1683_v58, %v3403_v15  ;;  %v1803_v49 = vsel %vm3859_vm0, %v3324_v6, %v3482_v14  ;;  %v1219_v58 = vld [vmem:[#allocation3] sm:$0xff]  ;;  %vm3869_vm9 = vmmov %vm3866_vm6 }
 0x48f   :  { %v2478_v29 = vpack.i.bf16 %v1569_v48, %v1568_v20  ;;  %v2503_v10 = vpack.i.bf16 %v1719_v61, %v1718_v25  ;;  %v1838_v45 = vmul.f32 %v1833_v39, %v3403_v15  ;;  %v1839_v22 = vmul.f32 %v1832_v63, %v3397_v32  ;;  %v1220_v39 = vld [vmem:[#allocation3 + $0x8] sm:$0xff] }
 0x490   :  { %1843 = vrot.lane.b32.xlu0 %v1837_v53, %s3847_s2  ;;  %1873 = vrot.lane.b32.xlu1 %v1867_v27, %s2614_s28  ;;  %v1533_v53 = vsel %vm483_vm11, %v3288_v26, %v3318_v56  ;;  %v1449_v26 = vmul.f32 %v3306_v60, %v3397_v32  ;;  %v1598_v56 = vmul.f32 %v1593_v55, %v3403_v15  ;;  %vm3858_vm11 = vcmask 293888  }
 0x491   :  { %v1538_v27 = vmul.f32 %v1533_v53, %v3403_v15  ;;  %v1508_v60 = vmul.f32 %v1503_v24, %v3403_v15  ;;  %v1743_v12 = vsel %vm3858_vm11, %v3316_v8, %v3375_v41  ;;  %v2513_v1 = vpack.i.bf16 %v1779_v18, %v1778_v13 }
 0x492   :  { %v2498_v31 = vpack.i.bf16 %v1689_v23, %v1688_v5  ;;  %v1748_v53 = vmul.f32 %v1743_v12, %v3403_v15  ;;  %v1808_v8 = vmul.f32 %v1803_v49, %v3403_v15  ;;  %v1809_v6 = vmul.f32 %v3482_v14, %v3397_v32  ;;  %v1929_v14 = vld [vmem:[%s3725_s4 + $0x8] sm:$0xff] }
 0x493   :  { %v2473_v51 = vpack.i.bf16 %v1539_v43, %v1538_v27  ;;  %v2468_v17 = vpack.i.bf16 %v1509_v57, %v1508_v60  ;;  %v2523_v43 = vpack.i.bf16 %v1839_v22, %v1838_v45  ;;  %2155 = vmatprep.mubr.msk.f32.mxu0 %vm3862_vm3, %v1929_v14  ;;  %v1221_v5 = vmul.f32 %v1219_v58, %v3331_v34 }
 0x494   :  { %2434 = vrot.lane.b32.xlu0 %v2433_v4, %s2597_s1  ;;  %2424 = vrot.lane.b32.xlu1 %v2423_v3, %s2595_s24  ;;  %v1599_v4 = vmul.f32 %v3326_v33, %v3397_v32  ;;  %v2458_v3 = vpack.i.bf16 %v1449_v26, %v1448_v0  ;;  %v2508_v0 = vpack.i.bf16 %v1749_v44, %v1748_v53  ;;  %vm3867_vm7 = vcmask 1031168  }
 0x495   :  { %v2518_v26 = vpack.i.bf16 %v1809_v6, %v1808_v8  ;;  %v1222_v23 = vmul.f32 %v1220_v39, %v3403_v15  ;;  %vm3868_vm8 = vmmov %vm3867_vm7  ;;  %vm3870_vm11 = vcmask 1006592   ;;  %vm3874_vm3 = vcmask 916480  }
 0x496   :  { %v2483_v33 = vpack.i.bf16 %v1599_v4, %v1598_v56  ;;  %vm3871_vm0 = vmmov %vm3870_vm11 }
 0x498   :  { %2444 = vrot.lane.b32.xlu0 %v2443_v50, %s2599_s21  ;;  %2429 = vrot.lane.b32.xlu1 %v2428_v62, %s2594_s25  ;;  %v1862_v50 = vpop.permute.xlu0 %1861  ;;  %v2493_v62 = vpack.i.bf16 %v1659_v59, %v1658_v42 }
 0x499   :  { %v1863_v41 = vsel %vm3861_vm2, %v3409_v47, %v1862_v50  ;;  %v1869_v24 = vmul.f32 %v1862_v50, %v3397_v32  ;;  %v1897_v47 = vmul.f32 %v1890_v28, %v3331_v34 }
 0x49a   :  { %v1868_v55 = vmul.f32 %v1863_v41, %v3403_v15 }
 0x49c   :  { %2454 = vrot.lane.b32.xlu0 %v2453_v30, %s2601_s19  ;;  %2439 = vrot.lane.b32.xlu1 %v2438_v9, %s2596_s23  ;;  %v2488_v30 = vpack.i.bf16 %v1629_v21, %v1628_v35  ;;  %v1892_v9 = vpop.permute.xlu0 %1891  ;;  %v2528_v4 = vpack.i.bf16 %v1869_v24, %v1868_v55 }
 0x49d   :  { %v1893_v27 = vsel %vm3860_vm1, %v1890_v28, %v1892_v9  ;;  %vm3872_vm1 = vcmask 1014784  }
 0x49e   :  { %vm3873_vm2 = vmmov %vm3872_vm1 }
 0x4a0   :  { %2464 = vrot.lane.b32.xlu0 %v2463_v19, %s2603_s17  ;;  %2449 = vrot.lane.b32.xlu1 %v2448_v40, %s2598_s22  ;;  %v1898_v19 = vmul.f32 %v1893_v27, %v3403_v15  ;;  %v1899_v40 = vmul.f32 %v1892_v9, %v3397_v32 }
 0x4a2   :  { %v2533_v56 = vpack.i.bf16 %v1899_v40, %v1898_v19 }
 0x4a4   :  { %2474 = vrot.lane.b32.xlu0 %v2473_v51, %s2605_s14  ;;  %2459 = vrot.lane.b32.xlu1 %v2458_v3, %s2600_s20  ;;  %v1980_v51 = vld [vmem:[%s3726_s5] sm:$0xff] }
 0x4a5   :  { %v46_v3 = vld [vmem:[%s3728_s7] sm:$0x3f] }
 0x4a8   :  { %2484 = vrot.lane.b32.xlu0 %v2483_v33, %s2607_s12  ;;  %2469 = vrot.lane.b32.xlu1 %v2468_v17, %s2602_s18 }
 0x4ac   :  { %2494 = vrot.lane.b32.xlu0 %v2493_v62, %s3843_s6  ;;  %2479 = vrot.lane.b32.xlu1 %v2478_v29, %s2604_s15 }
 0x4b0   :  { %2504 = vrot.lane.b32.xlu0 %v2503_v10, %s3844_s30  ;;  %2489 = vrot.lane.b32.xlu1 %v2488_v30, %s2606_s13 }
 0x4b4   :  { %2514 = vrot.lane.b32.xlu0 %v2513_v1, %s3846_s26  ;;  %2499 = vrot.lane.b32.xlu1 %v2498_v31, %s2608_s11 }
 0x4b8   :  { %2524 = vrot.lane.b32.xlu0 %v2523_v43, %s3847_s2  ;;  %2509 = vrot.lane.b32.xlu1 %v2508_v0, %s2610_s9  ;;  %s3863_s9 = smov 77  }
 0x4bc   :  { %2519 = vrot.lane.b32.xlu1 %v2518_v26, %s3845_s3  ;;  %2534 = vrot.lane.b32.xlu0 %v2533_v56, %s2616_s29 }
 0x4c0   :  { %2529 = vrot.lane.b32.xlu1 %v2528_v4, %s2614_s28  ;;  %1903 = vrot.lane.b32.xlu0 %v1897_v47, %s2616_s29 }
 0x4c4   :  { %1918 = vrot.lane.b32.xlu1 %v3403_v15, %s3863_s9  ;;  %1920 = vrot.lane.b32.xlu0 %v3397_v32, %s3863_s9 }
 0x4c8   :  { %1916 = vrot.lane.b32.xlu1 %v3331_v34, %s3863_s9  ;;  %1983 = vperm.xlu0 %2307, %v1980_v51  }
 0x4cc   :  { %1042 = vperm.xlu1 %2538, %v46_v3  }
 0x4da   :  { %v1244_v60 = vpop.permute.xlu0 %1243  ;;  %v1274_v57 = vpop.permute.xlu1 %1273 }
 0x4de   :  { %v1304_v36 = vpop.permute.xlu0 %1303  ;;  %v1334_v63 = vpop.permute.xlu1 %1333 }
 0x4e2   :  { %v1364_v54 = vpop.permute.xlu0 %1363  ;;  %v3593_v33 = vpop.permute.xlu1 %1393 }
 0x4e6   :  { %v3595_v32 = vpop.permute.xlu0 %1423  ;;  %v3597_v42 = vpop.permute.xlu1 %1453 }
 0x4ea   :  { %v3599_v17 = vpop.permute.xlu0 %1483  ;;  %v3601_v59 = vpop.permute.xlu1 %1513 }
 0x4ee   :  { %v3603_v20 = vpop.permute.xlu0 %1543  ;;  %v3605_v48 = vpop.permute.xlu1 %1573 }
 0x4f2   :  { %v3607_v46 = vpop.permute.xlu0 %1603  ;;  %v3609_v52 = vpop.permute.xlu1 %1633 }
 0x4f6   :  { %v3611_v25 = vpop.permute.xlu0 %1663  ;;  %v3613_v61 = vpop.permute.xlu1 %1693 }
 0x4fa   :  { %v3615_v50 = vpop.permute.xlu0 %1723  ;;  %v3617_v62 = vpop.permute.xlu1 %1753 }
 0x4fe   :  { %v3619_v29 = vpop.permute.xlu0 %1783  ;;  %v3621_v35 = vpop.permute.xlu1 %1813 }
 0x502   :  { %v3623_v21 = vpop.permute.xlu0 %1843  ;;  %v3625_v7 = vpop.permute.xlu1 %1873 }
 0x506   :  { %v2435_v10 = vpop.permute.xlu0 %2434  ;;  %v2425_v13 = vpop.permute.xlu1 %2424 }
 0x507   :  { %v2427_v30 = vunpack.i.h.bf16 %v2425_v13  ;;  %v2426_v18 = vunpack.i.l.bf16 %v2425_v13  ;;  %v2437_v9 = vunpack.i.h.bf16 %v2435_v10  ;;  %v2436_v12 = vunpack.i.l.bf16 %v2435_v10 }
 0x509   :  { %v1249_v49 = vsel %vm3864_vm4, %v1244_v60, %v2426_v18  ;;  %v1250_v45 = vsel %vm3865_vm5, %v2426_v18, %v2427_v30  ;;  %v1309_v6 = vsel %vm3866_vm6, %v1304_v36, %v2436_v12  ;;  %v1310_v43 = vsel %vm3869_vm9, %v2436_v12, %v2437_v9  ;;  %vm3877_vm6 = vmmov %vm3874_vm3 }
 0x50a   :  { %v2209_v22 = vpack.c.bf16 %v1249_v49, %v1221_v5  ;;  %v2445_v28 = vpop.permute.xlu0 %2444  ;;  %v2430_v1 = vpop.permute.xlu1 %2429  ;;  %v2207_v31 = vpack.c.bf16 %v1250_v45, %v1222_v23  ;;  %vm3875_vm4 = vcmask 998400   ;;  %vm3880_vm9 = vcmask 908288  }
 0x50b   :  { %v2432_v53 = vunpack.i.h.bf16 %v2430_v1  ;;  %v2431_v44 = vunpack.i.l.bf16 %v2430_v1  ;;  %v2447_v27 = vunpack.i.h.bf16 %v2445_v28  ;;  %v2446_v8 = vunpack.i.l.bf16 %v2445_v28  ;;  %vm3876_vm5 = vmmov %vm3875_vm4 }
 0x50c   :  { %2208 = vmatprep.subr.bf16.mxu0 %v2207_v31 }
 0x50d   :  { %v1279_v34 = vsel %vm3867_vm7, %v1274_v57, %v2431_v44  ;;  %2210 = vmatpush1.bf16.msra.mxu0 %v2209_v22  ;;  %v1280_v15 = vsel %vm3868_vm8, %v2431_v44, %v2432_v53  ;;  %v1369_v24 = vsel %vm3870_vm11, %v1364_v54, %v2446_v8  ;;  %v1370_v56 = vsel %vm3871_vm0, %v2446_v8, %v2447_v27  ;;  %vm3881_vm11 = vmmov %vm3880_vm9 }
 0x50e   :  { %v2213_v19 = vpack.c.bf16 %v1309_v6, %v1279_v34  ;;  %v2455_v40 = vpop.permute.xlu0 %2454  ;;  %v2440_v0 = vpop.permute.xlu1 %2439  ;;  %v2211_v41 = vpack.c.bf16 %v1310_v43, %v1280_v15  ;;  %vm3878_vm7 = vcmask 900096   ;;  %vm3882_vm0 = vcmask 883712  }
 0x50f   :  { %v2442_v26 = vunpack.i.h.bf16 %v2440_v0  ;;  %v2441_v55 = vunpack.i.l.bf16 %v2440_v0  ;;  %v2457_v14 = vunpack.i.h.bf16 %v2455_v40  ;;  %v2456_v47 = vunpack.i.l.bf16 %v2455_v40  ;;  %vm3879_vm8 = vmmov %vm3878_vm7 }
 0x510   :  { %2212 = vmatprep.subr.bf16.mxu0 %v2211_v41 }
 0x511   :  { %v1339_v4 = vsel %vm3872_vm1, %v1334_v63, %v2441_v55  ;;  %2214 = vmatpush1.bf16.msra.mxu0 %v2213_v19  ;;  %v1340_v51 = vsel %vm3873_vm2, %v2441_v55, %v2442_v26  ;;  %v1429_v54 = vsel %vm3874_vm3, %v3595_v32, %v2456_v47  ;;  %v1430_v18 = vsel %vm3877_vm6, %v2456_v47, %v2457_v14  ;;  %vm3885_vm3 = vmmov %vm3882_vm0 }
 0x512   :  { %v2217_v3 = vpack.c.bf16 %v1369_v24, %v1339_v4  ;;  %v2465_v60 = vpop.permute.xlu0 %2464  ;;  %v2450_v57 = vpop.permute.xlu1 %2449  ;;  %v2215_v36 = vpack.c.bf16 %v1370_v56, %v1340_v51  ;;  %vm3883_vm1 = vcmask 891904   ;;  %vm3888_vm6 = vcmask 875520  }
 0x513   :  { %v2452_v58 = vunpack.i.h.bf16 %v2450_v57  ;;  %v2451_v39 = vunpack.i.l.bf16 %v2450_v57  ;;  %v2467_v10 = vunpack.i.h.bf16 %v2465_v60  ;;  %v2466_v13 = vunpack.i.l.bf16 %v2465_v60  ;;  %vm3884_vm2 = vmmov %vm3883_vm1 }
 0x514   :  { %2216 = vmatprep.subr.bf16.mxu0 %v2215_v36 }
 0x515   :  { %v1399_v30 = vsel %vm3875_vm4, %v3593_v33, %v2451_v39  ;;  %2218 = vmatpush1.bf16.msra.mxu0 %v2217_v3  ;;  %v1400_v63 = vsel %vm3876_vm5, %v2451_v39, %v2452_v58  ;;  %v1489_v22 = vsel %vm3878_vm7, %v3599_v17, %v2466_v13  ;;  %v1490_v32 = vsel %vm3879_vm8, %v2466_v13, %v2467_v10  ;;  %vm3889_vm7 = vmmov %vm3888_vm6 }
 0x516   :  { %v2221_v5 = vpack.c.bf16 %v1429_v54, %v1399_v30  ;;  %v2475_v23 = vpop.permute.xlu0 %2474  ;;  %v2460_v9 = vpop.permute.xlu1 %2459  ;;  %v2219_v12 = vpack.c.bf16 %v1430_v18, %v1400_v63  ;;  %vm3886_vm4 = vcmask 867328   ;;  %vm3890_vm8 = vcmask 777216  }
 0x517   :  { %v2462_v49 = vunpack.i.h.bf16 %v2460_v9  ;;  %v2461_v45 = vunpack.i.l.bf16 %v2460_v9  ;;  %v2477_v28 = vunpack.i.h.bf16 %v2475_v23  ;;  %v2476_v1 = vunpack.i.l.bf16 %v2475_v23  ;;  %vm3887_vm5 = vmmov %vm3886_vm4 }
 0x518   :  { %2220 = vmatprep.subr.bf16.mxu0 %v2219_v12 }
 0x519   :  { %v1459_v33 = vsel %vm3880_vm9, %v3597_v42, %v2461_v45  ;;  %2222 = vmatpush1.bf16.msra.mxu0 %v2221_v5  ;;  %v1460_v31 = vsel %vm3881_vm11, %v2461_v45, %v2462_v49  ;;  %v1549_v17 = vsel %vm3882_vm0, %v3603_v20, %v2476_v1  ;;  %v1550_v40 = vsel %vm3885_vm3, %v2476_v1, %v2477_v28  ;;  %vm3893_vm0 = vmmov %vm3890_vm8 }
 0x51a   :  { %v2225_v53 = vpack.c.bf16 %v1489_v22, %v1459_v33  ;;  %v2485_v44 = vpop.permute.xlu0 %2484  ;;  %v2470_v27 = vpop.permute.xlu1 %2469  ;;  %v2223_v8 = vpack.c.bf16 %v1490_v32, %v1460_v31  ;;  %vm3891_vm9 = vcmask 785408   ;;  %vm3896_vm3 = vcmask 744448  }
 0x51b   :  { %v2472_v6 = vunpack.i.h.bf16 %v2470_v27  ;;  %v2471_v34 = vunpack.i.l.bf16 %v2470_v27  ;;  %v2487_v15 = vunpack.i.h.bf16 %v2485_v44  ;;  %v2486_v43 = vunpack.i.l.bf16 %v2485_v44  ;;  %vm3892_vm11 = vmmov %vm3891_vm9 }
 0x51c   :  { %2224 = vmatprep.subr.bf16.mxu0 %v2223_v8 }
 0x51d   :  { %v1519_v19 = vsel %vm3883_vm1, %v3601_v59, %v2471_v34  ;;  %2226 = vmatpush1.bf16.msra.mxu0 %v2225_v53  ;;  %v1520_v42 = vsel %vm3884_vm2, %v2471_v34, %v2472_v6  ;;  %v1609_v14 = vsel %vm3886_vm4, %v3607_v46, %v2486_v43  ;;  %v1610_v20 = vsel %vm3887_vm5, %v2486_v43, %v2487_v15  ;;  %vm3899_vm5 = vmmov %vm3896_vm3 }
 0x51e   :  { %v2229_v0 = vpack.c.bf16 %v1549_v17, %v1519_v19  ;;  %v2495_v41 = vpop.permute.xlu0 %2494  ;;  %v2480_v26 = vpop.permute.xlu1 %2479  ;;  %v2227_v55 = vpack.c.bf16 %v1550_v40, %v1520_v42  ;;  %vm3894_vm1 = vcmask 769024  }
 0x51f   :  { %v2482_v24 = vunpack.i.h.bf16 %v2480_v26  ;;  %v2481_v56 = vunpack.i.l.bf16 %v2480_v26  ;;  %v2497_v47 = vunpack.i.h.bf16 %v2495_v41  ;;  %v2496_v4 = vunpack.i.l.bf16 %v2495_v41  ;;  %vm3895_vm2 = vmmov %vm3894_vm1 }
 0x520   :  { %2228 = vmatprep.subr.bf16.mxu0 %v2227_v55 }
 0x521   :  { %v1579_v59 = vsel %vm3888_vm6, %v3605_v48, %v2481_v56  ;;  %2230 = vmatpush1.bf16.msra.mxu0 %v2229_v0  ;;  %v1580_v51 = vsel %vm3889_vm7, %v2481_v56, %v2482_v24  ;;  %v1669_v46 = vsel %vm3890_vm8, %v3611_v25, %v2496_v4  ;;  %v1670_v30 = vsel %vm3893_vm0, %v2496_v4, %v2497_v47 }
 0x522   :  { %v2233_v3 = vpack.c.bf16 %v1609_v14, %v1579_v59  ;;  %v2505_v60 = vpop.permute.xlu0 %2504  ;;  %v2490_v57 = vpop.permute.xlu1 %2489  ;;  %v2231_v36 = vpack.c.bf16 %v1610_v20, %v1580_v51  ;;  %vm3900_vm6 = vcmask 736256  }
 0x523   :  { %v2492_v58 = vunpack.i.h.bf16 %v2490_v57  ;;  %v2491_v39 = vunpack.i.l.bf16 %v2490_v57  ;;  %v2507_v10 = vunpack.i.h.bf16 %v2505_v60  ;;  %v2506_v13 = vunpack.i.l.bf16 %v2505_v60  ;;  %vm3901_vm7 = vmmov %vm3900_vm6 }
 0x524   :  { %2232 = vmatprep.subr.bf16.mxu0 %v2231_v36 }
 0x525   :  { %v1639_v54 = vsel %vm3891_vm9, %v3609_v52, %v2491_v39  ;;  %2234 = vmatpush1.bf16.msra.mxu0 %v2233_v3  ;;  %v1640_v48 = vsel %vm3892_vm11, %v2491_v39, %v2492_v58  ;;  %v1729_v49 = vsel %vm692_vm10, %v3615_v50, %v2506_v13  ;;  %v1730_v25 = vsel %vm692_vm10, %v2506_v13, %v2507_v10 }
 0x526   :  { %v2237_v63 = vpack.c.bf16 %v1669_v46, %v1639_v54  ;;  %v2515_v18 = vpop.permute.xlu0 %2514  ;;  %v2500_v5 = vpop.permute.xlu1 %2499  ;;  %v2235_v23 = vpack.c.bf16 %v1670_v30, %v1640_v48  ;;  %vm3897_vm10 = vcmask 752640  }
 0x527   :  { %v2502_v9 = vunpack.i.h.bf16 %v2500_v5  ;;  %v2501_v12 = vunpack.i.l.bf16 %v2500_v5  ;;  %v2517_v45 = vunpack.i.h.bf16 %v2515_v18  ;;  %v2516_v22 = vunpack.i.l.bf16 %v2515_v18  ;;  %vm3898_vm4 = vmmov %vm3897_vm10  ;;  %v2541_v5 = vld [vmem:[%s3721_s0 + $0x8] sm:$0x3f] }
 0x528   :  { %2236 = vmatprep.subr.bf16.mxu0 %v2235_v23 }
 0x529   :  { %v1699_v52 = vsel %vm3894_vm1, %v3613_v61, %v2501_v12  ;;  %2238 = vmatpush1.bf16.msra.mxu0 %v2237_v63  ;;  %v1700_v32 = vsel %vm3895_vm2, %v2501_v12, %v2502_v9  ;;  %v1789_v50 = vsel %vm3896_vm3, %v3619_v29, %v2516_v22  ;;  %v1790_v34 = vsel %vm3899_vm5, %v2516_v22, %v2517_v45  ;;  %v2540_v63 = vld [vmem:[%s3721_s0] sm:$0x3f] }
 0x52a   :  { %v2241_v28 = vpack.c.bf16 %v1729_v49, %v1699_v52  ;;  %v2525_v1 = vpop.permute.xlu0 %2524  ;;  %v2510_v33 = vpop.permute.xlu1 %2509  ;;  %v2239_v31 = vpack.c.bf16 %v1730_v25, %v1700_v32 }
 0x52b   :  { %v2512_v53 = vunpack.i.h.bf16 %v2510_v33  ;;  %v2511_v44 = vunpack.i.l.bf16 %v2510_v33  ;;  %v2527_v27 = vunpack.i.h.bf16 %v2525_v1  ;;  %v2526_v8 = vunpack.i.l.bf16 %v2525_v1 }
 0x52c   :  { %2240 = vmatprep.subr.bf16.mxu0 %v2239_v31 }
 0x52d   :  { %v1759_v6 = vsel %vm3897_vm10, %v3617_v62, %v2511_v44  ;;  %2242 = vmatpush1.bf16.msra.mxu0 %v2241_v28  ;;  %v1760_v61 = vsel %vm3898_vm4, %v2511_v44, %v2512_v53  ;;  %v1849_v0 = vsel %vm820_vm12, %v3623_v21, %v2526_v8  ;;  %v1850_v29 = vsel %vm820_vm12, %v2526_v8, %v2527_v27 }
 0x52e   :  { %v2245_v15 = vpack.c.bf16 %v1789_v50, %v1759_v6  ;;  %v2535_v43 = vpop.permute.xlu0 %2534  ;;  %v2520_v17 = vpop.permute.xlu1 %2519  ;;  %v2243_v19 = vpack.c.bf16 %v1790_v34, %v1760_v61  ;;  %vm3902_vm12 = vcmask 629760  }
 0x52f   :  { %v2522_v42 = vunpack.i.h.bf16 %v2520_v17  ;;  %v2521_v40 = vunpack.i.l.bf16 %v2520_v17  ;;  %v2537_v41 = vunpack.i.h.bf16 %v2535_v43  ;;  %v2536_v26 = vunpack.i.l.bf16 %v2535_v43  ;;  %vm3903_vm8 = vmmov %vm3902_vm12 }
 0x530   :  { %2244 = vmatprep.subr.bf16.mxu0 %v2243_v19 }
 0x531   :  { %v1819_v62 = vsel %vm3900_vm6, %v3621_v35, %v2521_v40  ;;  %2246 = vmatpush1.bf16.msra.mxu0 %v2245_v15  ;;  %v1820_v55 = vsel %vm3901_vm7, %v2521_v40, %v2522_v42  ;;  %v1910_v35 = vsel %vm884_vm15, %v2536_v26, %v2537_v41 }
 0x532   :  { %v2249_v24 = vpack.c.bf16 %v1849_v0, %v1819_v62  ;;  %v1904_v56 = vpop.permute.xlu0 %1903  ;;  %v2530_v14 = vpop.permute.xlu1 %2529  ;;  %v2247_v20 = vpack.c.bf16 %v1850_v29, %v1820_v55 }
 0x533   :  { %v2532_v47 = vunpack.i.h.bf16 %v2530_v14  ;;  %v2531_v4 = vunpack.i.l.bf16 %v2530_v14  ;;  %v1909_v21 = vsel %vm884_vm15, %v1904_v56, %v2536_v26 }
 0x534   :  { %2248 = vmatprep.subr.bf16.mxu0 %v2247_v20 }
 0x535   :  { %v1879_v59 = vsel %vm852_vm13, %v3625_v7, %v2531_v4  ;;  %2250 = vmatpush1.bf16.msra.mxu0 %v2249_v24  ;;  %v1880_v51 = vsel %vm852_vm13, %v2531_v4, %v2532_v47  ;;  %v1928_v7 = vld [vmem:[%s3725_s4] sm:$0xff] }
 0x536   :  { %v2253_v3 = vpack.c.bf16 %v1909_v21, %v1879_v59  ;;  %v1921_v60 = vpop.permute.xlu0 %1920  ;;  %v1919_v57 = vpop.permute.xlu1 %1918  ;;  %v2251_v36 = vpack.c.bf16 %v1910_v35, %v1880_v51 }
 0x537   :  { %v1923_v58 = vsel %vm3902_vm12, %v1919_v57, %v1921_v60 }
 0x538   :  { %2252 = vmatprep.subr.bf16.mxu0 %v2251_v36 }
 0x539   :  { %2254 = vmatpush1.bf16.msra.mxu0 %v2253_v3 }
 0x53a   :  { %v1917_v39 = vpop.permute.xlu1 %1916  ;;  %2037 = vmatprep.subr.mxu0 %v1923_v58 }
 0x53b   :  { %v1922_v10 = vsel %vm3903_vm8, %v1917_v39, %v1919_v57 }
 0x53d   :  { %2038 = vmatpush1.msra.mxu0 %v1922_v10 }
 0x53e   :  { %2054 = vmatmul.mubr.f32.vlgmr.msra.gmra.mrb[4].mxu0 %v1928_v7 }
 0x54b   :  { %v1043_v13 = vpop.permute.xlu1 %1042 }
 0x54c   :  { %v1116_v46 = vadd.f32 %v3247_v2, %v1043_v13  ;;  %v1118_v54 = vadd.f32 %v3249_v11, %v1043_v13  ;;  %v1984_v2 = vpop.permute.xlu0 %1983 }
 0x54e   :  { %v1120_v48 = vmax.f32 %v1116_v46, 0.0  ;;  %v1121_v30 = vmax.f32 %v1118_v54, 0.0 }
 0x550   :  { %v1122_v18 = vadd.f32 %v2540_v63, %v1120_v48  ;;  %v1123_v23 = vadd.f32 %v2541_v5, %v1121_v30 }
 0x552   :  { %1124 = vst [vmem:[%s3729_s8] sm:$0x3f] %v1122_v18  ;;  %1125 = vst [vmem:[%s3729_s8 + $0x8] sm:$0x3f] %v1123_v23 }
 0x611   :  { %v2055_v11 = vpop.f32.mrb[4].mxu0 }
 0x612   :  { %v2056_v9 = vadd.f32 %v2055_v11, %v1984_v2  ;;  %v2057_v12 = vpop.f32.mrb[5].mxu0 }
 0x613   :  { %v2058_v49 = vadd.f32 %v2057_v12, %v1984_v2 }
 0x614   :  { %v2060_v45 = vmax.f32 %v2056_v9, 0.0 }
 0x615   :  { %v2061_v25 = vmax.f32 %v2058_v49, 0.0 }
 0x617   :  { %2062 = vmatprep.subr.mxu1 %v2061_v25 }
 0x618   :  { %2063 = vmatpush1.msra.mxu1 %v2060_v45 }
 0x619   :  { %2156 = vmatmul.mubr.msk.f32.vlgmr.msra.gmra.mrb[4].mxu1 %vm1045_vm14, %v3221_v37 }
 0x6ec   :  { %v2128_v22 = vpop.f32.mrb[4].mxu1 }
 0x6ed   :  { %v2129_v52 = vadd.f32 %v2128_v22, %v1043_v13  ;;  %v2130_v32 = vpop.f32.mrb[5].mxu1 }
 0x6ee   :  { %v2131_v28 = vadd.f32 %v2130_v32, %v1043_v13 }
 0x6ef   :  { %v2133_v1 = vmax.f32 %v2129_v52, 0.0 }
 0x6f0   :  { %v2134_v33 = vmax.f32 %v2131_v28, 0.0 }
 0x6f1   :  { %v2135_v31 = vadd.f32 %v3231_v38, %v2133_v1 }
 0x6f2   :  { %v2136_v53 = vadd.f32 %v3226_v16, %v2134_v33 }
 0x6f3   :  { %2157 = vst [vmem:[%s3729_s8 + $0x10] sm:$0x3f] %v2135_v31 }
 0x6f4   :  { %2158 = vst [vmem:[%s3729_s8 + $0x18] sm:$0x3f] %v2136_v53 }
 0x6f5   :  { %2144 = vsyncpa [#allocation4], 1 }

</bundles_post_ra>
